<compile_context>
chip_gen: v5e
topology: v5e:2x2
jax: 0.10.0
libtpu: 0.0.40
codegen_flags: <defaults>
</compile_context>

<pallas_src>
import functools

import jax
import jax.numpy as jnp
from jax import lax
from jax.experimental import pallas as pl
from jax.experimental.pallas import tpu as pltpu

# Conv geometry of the DQNSolver conv stack (kernel size, stride per layer).
K1, S1 = 8, 4
K2, S2 = 4, 2
K3, S3 = 3, 1

LANE = 128   # TPU lane width: channel dims padded to this
SUB = 8      # f32 sublane count


def _round_up(v, m):
    return (v + m - 1) // m * m


# ----------------------------------------------------------------------------
# Fused forward kernel: runs once per sample (grid over batch).
#   p1_ref : (1, T2*P2B, KD)  bf16  conv1 patches, grouped per conv2 tap
#   w1     : (KD, 128)        bf16  conv1 weight (cols 0..31 real)
#   w2     : (16, 128, 128)   bf16  conv2 per-tap weights ([t, ic, oc])
#   w3     : (9, 128, 128)    bf16  conv3 per-position weights ([p, ic, oc])
#   wf1    : (128, 512) bf16, wf2: (512, 128) bf16
#   biases : f32, lane-padded, shape (1, lanes)
#   out    : (1, 8, 128) f32  row 0, cols 0..n_actions-1 are the Q-values
# ----------------------------------------------------------------------------
def _dqn_fused_kernel(p1_ref, w1_ref, b1_ref, w2_ref, b2_ref, w3_ref, b3_ref,
                      wf1_ref, bf1_ref, wf2_ref, bf2_ref, out_ref):
    f32 = jnp.float32
    bf16 = jnp.bfloat16

    # ---- conv1: one big matmul over all (tap-grouped) patch rows ----------
    a1 = jnp.dot(p1_ref[0], w1_ref[...], preferred_element_type=f32)
    a1 = jnp.maximum(a1 + b1_ref[...], 0.0).astype(bf16)        # (T2*P2B, 128)

    # ---- conv2: accumulate over the K2*K2 taps (contiguous 16-row blocks) --
    n_taps = w2_ref.shape[0]                                     # 16
    p2b = a1.shape[0] // n_taps                                  # 16
    acc2 = jnp.zeros((p2b, w2_ref.shape[2]), f32)
    for t in range(n_taps):
        acc2 = acc2 + jnp.dot(a1[t * p2b:(t + 1) * p2b, :], w2_ref[t],
                              preferred_element_type=f32)
    a2 = jnp.maximum(acc2 + b2_ref[...], 0.0)                    # (16, 128) f32
    # rows >= 9 of a2 are padding garbage and are never read below.

    # ---- conv3 (1x1 spatial output): accumulate over its 3x3 field --------
    n_pos = w3_ref.shape[0]                                      # 9
    acc3 = jnp.zeros((1, w3_ref.shape[2]), f32)
    for p in range(n_pos):
        acc3 = acc3 + jnp.dot(a2[p:p + 1, :].astype(bf16), w3_ref[p],
                              preferred_element_type=f32)
    h3 = jnp.maximum(acc3 + b3_ref[...], 0.0).astype(bf16)       # (1, 128)

    # ---- fc1 / fc2 ---------------------------------------------------------
    h4 = jnp.dot(h3, wf1_ref[...], preferred_element_type=f32)
    h4 = jnp.maximum(h4 + bf1_ref[...], 0.0).astype(bf16)        # (1, 512)
    q = jnp.dot(h4, wf2_ref[...], preferred_element_type=f32) + bf2_ref[...]

    # Lane-dense output block: broadcast the single row across 8 sublanes.
    out_ref[...] = jnp.broadcast_to(q, out_ref.shape).astype(out_ref.dtype)


# ----------------------------------------------------------------------------
# Wrapper-side im2col for conv1, ordered for the in-kernel conv2.
# ----------------------------------------------------------------------------
def _conv1_patches_for_conv2(x):
    """x: (N, C, H, W) f32 -> (N, K2*K2*P2B, round_up(C*K1*K1,128)) bf16.

    Rows are grouped by conv2 tap (kh2, kw2); within each 16-row block, row r
    (r < 9) holds the conv1 patch feeding conv2 output position r; remaining
    rows are zero.  Patch columns are flattened (c, kh1, kw1) to match the
    PyTorch weight layout."""
    N, C, H, W = x.shape
    oh1, ow1 = (H - K1) // S1 + 1, (W - K1) // S1 + 1
    oh2, ow2 = (oh1 - K2) // S2 + 1, (ow1 - K2) // S2 + 1
    p2 = oh2 * ow2
    p2b = _round_up(p2, 2 * SUB)   # 16-row tap blocks (bf16 vreg aligned)

    # Base conv1 patches via a single gather:  (N, oh1*ow1, C*K1*K1)
    ih = (S1 * jnp.arange(oh1))[:, None] + jnp.arange(K1)[None, :]   # (oh1, K1)
    iw = (S1 * jnp.arange(ow1))[:, None] + jnp.arange(K1)[None, :]   # (ow1, K1)
    p = x[:, :, ih[:, :, None, None], iw[None, None, :, :]]          # (N,C,oh1,K1,ow1,K1)
    p = p.transpose(0, 2, 4, 1, 3, 5).reshape(N, oh1 * ow1, C * K1 * K1)

    # Row order for the in-kernel conv2 tap accumulation (+ zero-pad rows).
    rows = []
    for kh2 in range(K2):
        for kw2 in range(K2):
            for r in range(p2b):
                if r < p2:
                    i2, j2 = divmod(r, ow2)
                    rows.append((S2 * i2 + kh2) * ow1 + (S2 * j2 + kw2))
                else:
                    rows.append(oh1 * ow1)        # index of the all-zero row
    rows = jnp.asarray(rows, dtype=jnp.int32)

    p = jnp.concatenate([p, jnp.zeros((N, 1, p.shape[-1]), p.dtype)], axis=1)
    p = jnp.take(p, rows, axis=1)                 # (N, K2*K2*p2b, C*K1*K1)

    kpad = _round_up(p.shape[-1], LANE) - p.shape[-1]
    if kpad:
        p = jnp.pad(p, ((0, 0), (0, 0), (0, kpad)))
    return p.astype(jnp.bfloat16)


# ----------------------------------------------------------------------------
# Parameters: raw (PyTorch-layout) init + one-time kernel-ready preparation.
# ----------------------------------------------------------------------------
def init_dqn_params(key, input_shape, n_actions):
    C, H, W = input_shape
    h1, w1 = (H - K1) // S1 + 1, (W - K1) // S1 + 1
    h2, w2 = (h1 - K2) // S2 + 1, (w1 - K2) // S2 + 1
    h3, w3 = (h2 - K3) // S3 + 1, (w2 - K3) // S3 + 1
    conv_out = 64 * h3 * w3

    ks = jax.random.split(key, 10)
    s = 0.05
    return {
        "cw1": s * jax.random.normal(ks[0], (32, C, K1, K1), jnp.float32),
        "cb1": s * jax.random.normal(ks[1], (32,), jnp.float32),
        "cw2": s * jax.random.normal(ks[2], (64, 32, K2, K2), jnp.float32),
        "cb2": s * jax.random.normal(ks[3], (64,), jnp.float32),
        "cw3": s * jax.random.normal(ks[4], (64, 64, K3, K3), jnp.float32),
        "cb3": s * jax.random.normal(ks[5], (64,), jnp.float32),
        "fw1": s * jax.random.normal(ks[6], (512, conv_out), jnp.float32),
        "fb1": s * jax.random.normal(ks[7], (512,), jnp.float32),
        "fw2": s * jax.random.normal(ks[8], (n_actions, 512), jnp.float32),
        "fb2": s * jax.random.normal(ks[9], (n_actions,), jnp.float32),
    }


def prepare_fused_params(raw, input_shape, n_actions):
    """One-time layout transform: pre-transpose, lane-pad to 128, cast bf16."""
    C, H, W = input_shape
    oh1, ow1 = (H - K1) // S1 + 1, (W - K1) // S1 + 1
    oh2, ow2 = (oh1 - K2) // S2 + 1, (ow1 - K2) // S2 + 1
    oh3, ow3 = oh2 - K3 + 1, ow2 - K3 + 1
    assert oh3 == 1 and ow3 == 1, "fused kernel assumes the conv stack -> 1x1"
    assert oh2 == K3 and ow2 == K3

    kd = C * K1 * K1
    kdp = _round_up(kd, LANE)

    def pad2(a, r, c):
        return jnp.pad(a, ((0, r - a.shape[0]), (0, c - a.shape[1])))

    def padb(b, c):
        return jnp.pad(b.reshape(1, -1),
                       ((0, 0), (0, c - b.shape[0]))).astype(jnp.float32)

    w1 = pad2(raw["cw1"].reshape(32, kd).T, kdp, LANE).astype(jnp.bfloat16)

    w2 = jnp.transpose(raw["cw2"], (2, 3, 1, 0)).reshape(K2 * K2, 32, 64)
    w2 = jnp.pad(w2, ((0, 0), (0, LANE - 32), (0, LANE - 64))).astype(jnp.bfloat16)

    w3 = jnp.transpose(raw["cw3"], (2, 3, 1, 0)).reshape(K3 * K3, 64, 64)
    w3 = jnp.pad(w3, ((0, 0), (0, LANE - 64), (0, LANE - 64))).astype(jnp.bfloat16)

    wf1 = pad2(raw["fw1"].T, LANE, 512).astype(jnp.bfloat16)       # (128, 512)
    wf2 = pad2(raw["fw2"].T, 512, LANE).astype(jnp.bfloat16)       # (512, 128)

    return {
        "w1": w1, "b1": padb(raw["cb1"], LANE),
        "w2": w2, "b2": padb(raw["cb2"], LANE),
        "w3": w3, "b3": padb(raw["cb3"], LANE),
        "wf1": wf1, "bf1": padb(raw["fb1"], 512),
        "wf2": wf2, "bf2": padb(raw["fb2"], LANE),
    }


# ----------------------------------------------------------------------------
# Single fused pallas_call (grid over batch, parallel for v7x's 2nd core).
# ----------------------------------------------------------------------------
def _fused_pallas(p1g, prep):
    N, M1, KD = p1g.shape

    def const_spec(a):
        zeros = (0,) * a.ndim
        return pl.BlockSpec(a.shape, lambda n, _z=zeros: _z)

    weights = [prep[k] for k in ("w1", "b1", "w2", "b2", "w3", "b3",
                                 "wf1", "bf1", "wf2", "bf2")]
    return pl.pallas_call(
        _dqn_fused_kernel,
        out_shape=jax.ShapeDtypeStruct((N, SUB, LANE), jnp.float32),
        grid=(N,),
        in_specs=[pl.BlockSpec((1, M1, KD), lambda n: (n, 0, 0))]
                 + [const_spec(a) for a in weights],
        out_specs=pl.BlockSpec((1, SUB, LANE), lambda n: (n, 0, 0)),
        compiler_params=pltpu.CompilerParams(
            dimension_semantics=("parallel",)),
    )(p1g, *weights)


def dqn_forward(prep, x, n_actions):
    """x: (N, C, H, W) float32 -> (N, n_actions) float32."""
    p1g = _conv1_patches_for_conv2(x)
    q_pad = _fused_pallas(p1g, prep)           # (N, 8, 128) f32
    return q_pad[:, 0, :n_actions]


# ----------------------------------------------------------------------------
# Pure-JAX f32 reference (mirrors the PyTorch module exactly).
# ----------------------------------------------------------------------------
def dqn_forward_reference(raw, x):
    dn = ("NCHW", "OIHW", "NCHW")
    hp = lax.Precision.HIGHEST
    h = lax.conv_general_dilated(x, raw["cw1"], (S1, S1), "VALID",
                                 dimension_numbers=dn, precision=hp)
    h = jax.nn.relu(h + raw["cb1"][None, :, None, None])
    h = lax.conv_general_dilated(h, raw["cw2"], (S2, S2), "VALID",
                                 dimension_numbers=dn, precision=hp)
    h = jax.nn.relu(h + raw["cb2"][None, :, None, None])
    h = lax.conv_general_dilated(h, raw["cw3"], (S3, S3), "VALID",
                                 dimension_numbers=dn, precision=hp)
    h = jax.nn.relu(h + raw["cb3"][None, :, None, None])
    flat = h.reshape(x.shape[0], -1)
    h = jax.nn.relu(jnp.dot(flat, raw["fw1"].T, precision=hp) + raw["fb1"])
    return jnp.dot(h, raw["fw2"].T, precision=hp) + raw["fb2"]


if __name__ == "__main__":
    key = jax.random.PRNGKey(0)
    k_params, k_x = jax.random.split(key)

    input_shape = (4, 36, 36)   # (C, H, W): conv stack -> 8x8 -> 3x3 -> 1x1
    n_actions = 6
    batch = 2

    raw = init_dqn_params(k_params, input_shape, n_actions)
    prep = prepare_fused_params(raw, input_shape, n_actions)
    x = jax.random.normal(k_x, (batch,) + input_shape, jnp.float32)

    fwd = jax.jit(functools.partial(dqn_forward, n_actions=n_actions))
    q_values = fwd(prep, x)
    jax.block_until_ready(q_values)

    assert q_values.shape == (batch, n_actions), q_values.shape
    assert q_values.dtype == jnp.float32

    # Correctness vs. an f32 XLA reference (bf16 MXU inputs => loose tolerance).
    q_ref = dqn_forward_reference(raw, x)
    err = float(jnp.max(jnp.abs(q_values - q_ref)))
    assert err < 3e-2, f"mismatch vs reference: max abs err {err}"

    print("KERNEL_OK")
</pallas_src>

<mosaic_0001>
module attributes {stable_mosaic.version = 11 : i64} {
  func.func @_dqn_fused_kernel(%arg0: i32, %arg1: memref<1x256x256xbf16, #tpu.memory_space<vmem>>, %arg2: memref<256x128xbf16, #tpu.memory_space<vmem>>, %arg3: memref<1x128xf32, #tpu.memory_space<vmem>>, %arg4: memref<16x128x128xbf16, #tpu.memory_space<vmem>>, %arg5: memref<1x128xf32, #tpu.memory_space<vmem>>, %arg6: memref<9x128x128xbf16, #tpu.memory_space<vmem>>, %arg7: memref<1x128xf32, #tpu.memory_space<vmem>>, %arg8: memref<128x512xbf16, #tpu.memory_space<vmem>>, %arg9: memref<1x512xf32, #tpu.memory_space<vmem>>, %arg10: memref<512x128xbf16, #tpu.memory_space<vmem>>, %arg11: memref<1x128xf32, #tpu.memory_space<vmem>>, %arg12: memref<1x8x128xf32, #tpu.memory_space<vmem>>) attributes {dimension_semantics = [#tpu.dimension_semantics<parallel>], iteration_bounds = array<i64: 2>, scalar_prefetch = 0 : i64, scratch_operands = 0 : i64, tpu.core_type = #tpu.core_type<tc>, window_params = [{transform_indices = @transform_0, window_bounds = array<i64: 1, 256, 256>}, {pipeline_mode = #tpu.pipeline_mode<synchronous>, transform_indices = @transform_1, window_bounds = array<i64: 256, 128>}, {pipeline_mode = #tpu.pipeline_mode<synchronous>, transform_indices = @transform_2, window_bounds = array<i64: 1, 128>}, {pipeline_mode = #tpu.pipeline_mode<synchronous>, transform_indices = @transform_3, window_bounds = array<i64: 16, 128, 128>}, {pipeline_mode = #tpu.pipeline_mode<synchronous>, transform_indices = @transform_4, window_bounds = array<i64: 1, 128>}, {pipeline_mode = #tpu.pipeline_mode<synchronous>, transform_indices = @transform_5, window_bounds = array<i64: 9, 128, 128>}, {pipeline_mode = #tpu.pipeline_mode<synchronous>, transform_indices = @transform_6, window_bounds = array<i64: 1, 128>}, {pipeline_mode = #tpu.pipeline_mode<synchronous>, transform_indices = @transform_7, window_bounds = array<i64: 128, 512>}, {pipeline_mode = #tpu.pipeline_mode<synchronous>, transform_indices = @transform_8, window_bounds = array<i64: 1, 512>}, {pipeline_mode = #tpu.pipeline_mode<synchronous>, transform_indices = @transform_9, window_bounds = array<i64: 512, 128>}, {pipeline_mode = #tpu.pipeline_mode<synchronous>, transform_indices = @transform_10, window_bounds = array<i64: 1, 128>}, {transform_indices = @transform_11, window_bounds = array<i64: 1, 8, 128>}]} {
    %c0 = arith.constant 0 : index
    %c0_0 = arith.constant 0 : index
    %c0_1 = arith.constant 0 : index
    %0 = vector.load %arg1[%c0, %c0_0, %c0_1] : memref<1x256x256xbf16, #tpu.memory_space<vmem>>, vector<1x256x256xbf16>
    %1 = vector.shape_cast %0 : vector<1x256x256xbf16> to vector<256x256xbf16>
    %c0_2 = arith.constant 0 : index
    %c0_3 = arith.constant 0 : index
    %2 = vector.load %arg2[%c0_2, %c0_3] : memref<256x128xbf16, #tpu.memory_space<vmem>>, vector<256x128xbf16>
    %cst = arith.constant dense<0.000000e+00> : vector<256x128xf32>
    %3 = tpu.matmul %1, %2, %cst {dimension_numbers = #tpu.dot_dimension_numbers<[1], [0], [0], [1], [0, 0, 1, 1], [], []>} : vector<256x256xbf16>, vector<256x128xbf16>, vector<256x128xf32> -> vector<256x128xf32>
    %c0_4 = arith.constant 0 : index
    %c0_5 = arith.constant 0 : index
    %4 = vector.load %arg3[%c0_4, %c0_5] : memref<1x128xf32, #tpu.memory_space<vmem>>, vector<1x128xf32>
    %5 = vector.broadcast %4 : vector<1x128xf32> to vector<256x128xf32>
    %6 = arith.addf %3, %5 : vector<256x128xf32>
    %cst_6 = arith.constant 0.000000e+00 : f32
    %7 = vector.broadcast %cst_6 : f32 to vector<256x128xf32>
    %8 = arith.maximumf %6, %7 : vector<256x128xf32>
    %9 = arith.truncf %8 : vector<256x128xf32> to vector<256x128xbf16>
    %cst_7 = arith.constant 0.000000e+00 : f32
    %10 = vector.broadcast %cst_7 : f32 to vector<16x128xf32>
    %11 = vector.extract_strided_slice %9 {offsets = [0, 0], sizes = [16, 128], strides = [1, 1]} : vector<256x128xbf16> to vector<16x128xbf16>
    %c0_8 = arith.constant 0 : index
    %c0_9 = arith.constant 0 : index
    %c0_10 = arith.constant 0 : index
    %12 = vector.load %arg4[%c0_8, %c0_9, %c0_10] : memref<16x128x128xbf16, #tpu.memory_space<vmem>>, vector<1x128x128xbf16>
    %13 = vector.shape_cast %12 : vector<1x128x128xbf16> to vector<128x128xbf16>
    %cst_11 = arith.constant dense<0.000000e+00> : vector<16x128xf32>
    %14 = tpu.matmul %11, %13, %cst_11 {dimension_numbers = #tpu.dot_dimension_numbers<[1], [0], [0], [1], [0, 0, 1, 1], [], []>} : vector<16x128xbf16>, vector<128x128xbf16>, vector<16x128xf32> -> vector<16x128xf32>
    %15 = arith.addf %10, %14 : vector<16x128xf32>
    %16 = vector.extract_strided_slice %9 {offsets = [16, 0], sizes = [16, 128], strides = [1, 1]} : vector<256x128xbf16> to vector<16x128xbf16>
    %c1 = arith.constant 1 : index
    %c0_12 = arith.constant 0 : index
    %c0_13 = arith.constant 0 : index
    %17 = vector.load %arg4[%c1, %c0_12, %c0_13] : memref<16x128x128xbf16, #tpu.memory_space<vmem>>, vector<1x128x128xbf16>
    %18 = vector.shape_cast %17 : vector<1x128x128xbf16> to vector<128x128xbf16>
    %cst_14 = arith.constant dense<0.000000e+00> : vector<16x128xf32>
    %19 = tpu.matmul %16, %18, %cst_14 {dimension_numbers = #tpu.dot_dimension_numbers<[1], [0], [0], [1], [0, 0, 1, 1], [], []>} : vector<16x128xbf16>, vector<128x128xbf16>, vector<16x128xf32> -> vector<16x128xf32>
    %20 = arith.addf %15, %19 : vector<16x128xf32>
    %21 = vector.extract_strided_slice %9 {offsets = [32, 0], sizes = [16, 128], strides = [1, 1]} : vector<256x128xbf16> to vector<16x128xbf16>
    %c2 = arith.constant 2 : index
    %c0_15 = arith.constant 0 : index
    %c0_16 = arith.constant 0 : index
    %22 = vector.load %arg4[%c2, %c0_15, %c0_16] : memref<16x128x128xbf16, #tpu.memory_space<vmem>>, vector<1x128x128xbf16>
    %23 = vector.shape_cast %22 : vector<1x128x128xbf16> to vector<128x128xbf16>
    %cst_17 = arith.constant dense<0.000000e+00> : vector<16x128xf32>
    %24 = tpu.matmul %21, %23, %cst_17 {dimension_numbers = #tpu.dot_dimension_numbers<[1], [0], [0], [1], [0, 0, 1, 1], [], []>} : vector<16x128xbf16>, vector<128x128xbf16>, vector<16x128xf32> -> vector<16x128xf32>
    %25 = arith.addf %20, %24 : vector<16x128xf32>
    %26 = vector.extract_strided_slice %9 {offsets = [48, 0], sizes = [16, 128], strides = [1, 1]} : vector<256x128xbf16> to vector<16x128xbf16>
    %c3 = arith.constant 3 : index
    %c0_18 = arith.constant 0 : index
    %c0_19 = arith.constant 0 : index
    %27 = vector.load %arg4[%c3, %c0_18, %c0_19] : memref<16x128x128xbf16, #tpu.memory_space<vmem>>, vector<1x128x128xbf16>
    %28 = vector.shape_cast %27 : vector<1x128x128xbf16> to vector<128x128xbf16>
    %cst_20 = arith.constant dense<0.000000e+00> : vector<16x128xf32>
    %29 = tpu.matmul %26, %28, %cst_20 {dimension_numbers = #tpu.dot_dimension_numbers<[1], [0], [0], [1], [0, 0, 1, 1], [], []>} : vector<16x128xbf16>, vector<128x128xbf16>, vector<16x128xf32> -> vector<16x128xf32>
    %30 = arith.addf %25, %29 : vector<16x128xf32>
    %31 = vector.extract_strided_slice %9 {offsets = [64, 0], sizes = [16, 128], strides = [1, 1]} : vector<256x128xbf16> to vector<16x128xbf16>
    %c4 = arith.constant 4 : index
    %c0_21 = arith.constant 0 : index
    %c0_22 = arith.constant 0 : index
    %32 = vector.load %arg4[%c4, %c0_21, %c0_22] : memref<16x128x128xbf16, #tpu.memory_space<vmem>>, vector<1x128x128xbf16>
    %33 = vector.shape_cast %32 : vector<1x128x128xbf16> to vector<128x128xbf16>
    %cst_23 = arith.constant dense<0.000000e+00> : vector<16x128xf32>
    %34 = tpu.matmul %31, %33, %cst_23 {dimension_numbers = #tpu.dot_dimension_numbers<[1], [0], [0], [1], [0, 0, 1, 1], [], []>} : vector<16x128xbf16>, vector<128x128xbf16>, vector<16x128xf32> -> vector<16x128xf32>
    %35 = arith.addf %30, %34 : vector<16x128xf32>
    %36 = vector.extract_strided_slice %9 {offsets = [80, 0], sizes = [16, 128], strides = [1, 1]} : vector<256x128xbf16> to vector<16x128xbf16>
    %c5 = arith.constant 5 : index
    %c0_24 = arith.constant 0 : index
    %c0_25 = arith.constant 0 : index
    %37 = vector.load %arg4[%c5, %c0_24, %c0_25] : memref<16x128x128xbf16, #tpu.memory_space<vmem>>, vector<1x128x128xbf16>
    %38 = vector.shape_cast %37 : vector<1x128x128xbf16> to vector<128x128xbf16>
    %cst_26 = arith.constant dense<0.000000e+00> : vector<16x128xf32>
    %39 = tpu.matmul %36, %38, %cst_26 {dimension_numbers = #tpu.dot_dimension_numbers<[1], [0], [0], [1], [0, 0, 1, 1], [], []>} : vector<16x128xbf16>, vector<128x128xbf16>, vector<16x128xf32> -> vector<16x128xf32>
    %40 = arith.addf %35, %39 : vector<16x128xf32>
    %41 = vector.extract_strided_slice %9 {offsets = [96, 0], sizes = [16, 128], strides = [1, 1]} : vector<256x128xbf16> to vector<16x128xbf16>
    %c6 = arith.constant 6 : index
    %c0_27 = arith.constant 0 : index
    %c0_28 = arith.constant 0 : index
    %42 = vector.load %arg4[%c6, %c0_27, %c0_28] : memref<16x128x128xbf16, #tpu.memory_space<vmem>>, vector<1x128x128xbf16>
    %43 = vector.shape_cast %42 : vector<1x128x128xbf16> to vector<128x128xbf16>
    %cst_29 = arith.constant dense<0.000000e+00> : vector<16x128xf32>
    %44 = tpu.matmul %41, %43, %cst_29 {dimension_numbers = #tpu.dot_dimension_numbers<[1], [0], [0], [1], [0, 0, 1, 1], [], []>} : vector<16x128xbf16>, vector<128x128xbf16>, vector<16x128xf32> -> vector<16x128xf32>
    %45 = arith.addf %40, %44 : vector<16x128xf32>
    %46 = vector.extract_strided_slice %9 {offsets = [112, 0], sizes = [16, 128], strides = [1, 1]} : vector<256x128xbf16> to vector<16x128xbf16>
    %c7 = arith.constant 7 : index
    %c0_30 = arith.constant 0 : index
    %c0_31 = arith.constant 0 : index
    %47 = vector.load %arg4[%c7, %c0_30, %c0_31] : memref<16x128x128xbf16, #tpu.memory_space<vmem>>, vector<1x128x128xbf16>
    %48 = vector.shape_cast %47 : vector<1x128x128xbf16> to vector<128x128xbf16>
    %cst_32 = arith.constant dense<0.000000e+00> : vector<16x128xf32>
    %49 = tpu.matmul %46, %48, %cst_32 {dimension_numbers = #tpu.dot_dimension_numbers<[1], [0], [0], [1], [0, 0, 1, 1], [], []>} : vector<16x128xbf16>, vector<128x128xbf16>, vector<16x128xf32> -> vector<16x128xf32>
    %50 = arith.addf %45, %49 : vector<16x128xf32>
    %51 = vector.extract_strided_slice %9 {offsets = [128, 0], sizes = [16, 128], strides = [1, 1]} : vector<256x128xbf16> to vector<16x128xbf16>
    %c8 = arith.constant 8 : index
    %c0_33 = arith.constant 0 : index
    %c0_34 = arith.constant 0 : index
    %52 = vector.load %arg4[%c8, %c0_33, %c0_34] : memref<16x128x128xbf16, #tpu.memory_space<vmem>>, vector<1x128x128xbf16>
    %53 = vector.shape_cast %52 : vector<1x128x128xbf16> to vector<128x128xbf16>
    %cst_35 = arith.constant dense<0.000000e+00> : vector<16x128xf32>
    %54 = tpu.matmul %51, %53, %cst_35 {dimension_numbers = #tpu.dot_dimension_numbers<[1], [0], [0], [1], [0, 0, 1, 1], [], []>} : vector<16x128xbf16>, vector<128x128xbf16>, vector<16x128xf32> -> vector<16x128xf32>
    %55 = arith.addf %50, %54 : vector<16x128xf32>
    %56 = vector.extract_strided_slice %9 {offsets = [144, 0], sizes = [16, 128], strides = [1, 1]} : vector<256x128xbf16> to vector<16x128xbf16>
    %c9 = arith.constant 9 : index
    %c0_36 = arith.constant 0 : index
    %c0_37 = arith.constant 0 : index
    %57 = vector.load %arg4[%c9, %c0_36, %c0_37] : memref<16x128x128xbf16, #tpu.memory_space<vmem>>, vector<1x128x128xbf16>
    %58 = vector.shape_cast %57 : vector<1x128x128xbf16> to vector<128x128xbf16>
    %cst_38 = arith.constant dense<0.000000e+00> : vector<16x128xf32>
    %59 = tpu.matmul %56, %58, %cst_38 {dimension_numbers = #tpu.dot_dimension_numbers<[1], [0], [0], [1], [0, 0, 1, 1], [], []>} : vector<16x128xbf16>, vector<128x128xbf16>, vector<16x128xf32> -> vector<16x128xf32>
    %60 = arith.addf %55, %59 : vector<16x128xf32>
    %61 = vector.extract_strided_slice %9 {offsets = [160, 0], sizes = [16, 128], strides = [1, 1]} : vector<256x128xbf16> to vector<16x128xbf16>
    %c10 = arith.constant 10 : index
    %c0_39 = arith.constant 0 : index
    %c0_40 = arith.constant 0 : index
    %62 = vector.load %arg4[%c10, %c0_39, %c0_40] : memref<16x128x128xbf16, #tpu.memory_space<vmem>>, vector<1x128x128xbf16>
    %63 = vector.shape_cast %62 : vector<1x128x128xbf16> to vector<128x128xbf16>
    %cst_41 = arith.constant dense<0.000000e+00> : vector<16x128xf32>
    %64 = tpu.matmul %61, %63, %cst_41 {dimension_numbers = #tpu.dot_dimension_numbers<[1], [0], [0], [1], [0, 0, 1, 1], [], []>} : vector<16x128xbf16>, vector<128x128xbf16>, vector<16x128xf32> -> vector<16x128xf32>
    %65 = arith.addf %60, %64 : vector<16x128xf32>
    %66 = vector.extract_strided_slice %9 {offsets = [176, 0], sizes = [16, 128], strides = [1, 1]} : vector<256x128xbf16> to vector<16x128xbf16>
    %c11 = arith.constant 11 : index
    %c0_42 = arith.constant 0 : index
    %c0_43 = arith.constant 0 : index
    %67 = vector.load %arg4[%c11, %c0_42, %c0_43] : memref<16x128x128xbf16, #tpu.memory_space<vmem>>, vector<1x128x128xbf16>
    %68 = vector.shape_cast %67 : vector<1x128x128xbf16> to vector<128x128xbf16>
    %cst_44 = arith.constant dense<0.000000e+00> : vector<16x128xf32>
    %69 = tpu.matmul %66, %68, %cst_44 {dimension_numbers = #tpu.dot_dimension_numbers<[1], [0], [0], [1], [0, 0, 1, 1], [], []>} : vector<16x128xbf16>, vector<128x128xbf16>, vector<16x128xf32> -> vector<16x128xf32>
    %70 = arith.addf %65, %69 : vector<16x128xf32>
    %71 = vector.extract_strided_slice %9 {offsets = [192, 0], sizes = [16, 128], strides = [1, 1]} : vector<256x128xbf16> to vector<16x128xbf16>
    %c12 = arith.constant 12 : index
    %c0_45 = arith.constant 0 : index
    %c0_46 = arith.constant 0 : index
    %72 = vector.load %arg4[%c12, %c0_45, %c0_46] : memref<16x128x128xbf16, #tpu.memory_space<vmem>>, vector<1x128x128xbf16>
    %73 = vector.shape_cast %72 : vector<1x128x128xbf16> to vector<128x128xbf16>
    %cst_47 = arith.constant dense<0.000000e+00> : vector<16x128xf32>
    %74 = tpu.matmul %71, %73, %cst_47 {dimension_numbers = #tpu.dot_dimension_numbers<[1], [0], [0], [1], [0, 0, 1, 1], [], []>} : vector<16x128xbf16>, vector<128x128xbf16>, vector<16x128xf32> -> vector<16x128xf32>
    %75 = arith.addf %70, %74 : vector<16x128xf32>
    %76 = vector.extract_strided_slice %9 {offsets = [208, 0], sizes = [16, 128], strides = [1, 1]} : vector<256x128xbf16> to vector<16x128xbf16>
    %c13 = arith.constant 13 : index
    %c0_48 = arith.constant 0 : index
    %c0_49 = arith.constant 0 : index
    %77 = vector.load %arg4[%c13, %c0_48, %c0_49] : memref<16x128x128xbf16, #tpu.memory_space<vmem>>, vector<1x128x128xbf16>
    %78 = vector.shape_cast %77 : vector<1x128x128xbf16> to vector<128x128xbf16>
    %cst_50 = arith.constant dense<0.000000e+00> : vector<16x128xf32>
    %79 = tpu.matmul %76, %78, %cst_50 {dimension_numbers = #tpu.dot_dimension_numbers<[1], [0], [0], [1], [0, 0, 1, 1], [], []>} : vector<16x128xbf16>, vector<128x128xbf16>, vector<16x128xf32> -> vector<16x128xf32>
    %80 = arith.addf %75, %79 : vector<16x128xf32>
    %81 = vector.extract_strided_slice %9 {offsets = [224, 0], sizes = [16, 128], strides = [1, 1]} : vector<256x128xbf16> to vector<16x128xbf16>
    %c14 = arith.constant 14 : index
    %c0_51 = arith.constant 0 : index
    %c0_52 = arith.constant 0 : index
    %82 = vector.load %arg4[%c14, %c0_51, %c0_52] : memref<16x128x128xbf16, #tpu.memory_space<vmem>>, vector<1x128x128xbf16>
    %83 = vector.shape_cast %82 : vector<1x128x128xbf16> to vector<128x128xbf16>
    %cst_53 = arith.constant dense<0.000000e+00> : vector<16x128xf32>
    %84 = tpu.matmul %81, %83, %cst_53 {dimension_numbers = #tpu.dot_dimension_numbers<[1], [0], [0], [1], [0, 0, 1, 1], [], []>} : vector<16x128xbf16>, vector<128x128xbf16>, vector<16x128xf32> -> vector<16x128xf32>
    %85 = arith.addf %80, %84 : vector<16x128xf32>
    %86 = vector.extract_strided_slice %9 {offsets = [240, 0], sizes = [16, 128], strides = [1, 1]} : vector<256x128xbf16> to vector<16x128xbf16>
    %c15 = arith.constant 15 : index
    %c0_54 = arith.constant 0 : index
    %c0_55 = arith.constant 0 : index
    %87 = vector.load %arg4[%c15, %c0_54, %c0_55] : memref<16x128x128xbf16, #tpu.memory_space<vmem>>, vector<1x128x128xbf16>
    %88 = vector.shape_cast %87 : vector<1x128x128xbf16> to vector<128x128xbf16>
    %cst_56 = arith.constant dense<0.000000e+00> : vector<16x128xf32>
    %89 = tpu.matmul %86, %88, %cst_56 {dimension_numbers = #tpu.dot_dimension_numbers<[1], [0], [0], [1], [0, 0, 1, 1], [], []>} : vector<16x128xbf16>, vector<128x128xbf16>, vector<16x128xf32> -> vector<16x128xf32>
    %90 = arith.addf %85, %89 : vector<16x128xf32>
    %c0_57 = arith.constant 0 : index
    %c0_58 = arith.constant 0 : index
    %91 = vector.load %arg5[%c0_57, %c0_58] : memref<1x128xf32, #tpu.memory_space<vmem>>, vector<1x128xf32>
    %92 = vector.broadcast %91 : vector<1x128xf32> to vector<16x128xf32>
    %93 = arith.addf %90, %92 : vector<16x128xf32>
    %cst_59 = arith.constant 0.000000e+00 : f32
    %94 = vector.broadcast %cst_59 : f32 to vector<16x128xf32>
    %95 = arith.maximumf %93, %94 : vector<16x128xf32>
    %cst_60 = arith.constant 0.000000e+00 : f32
    %96 = vector.broadcast %cst_60 : f32 to vector<1x128xf32>
    %97 = vector.extract_strided_slice %95 {offsets = [0, 0], sizes = [1, 128], strides = [1, 1]} : vector<16x128xf32> to vector<1x128xf32>
    %98 = arith.truncf %97 : vector<1x128xf32> to vector<1x128xbf16>
    %c0_61 = arith.constant 0 : index
    %c0_62 = arith.constant 0 : index
    %c0_63 = arith.constant 0 : index
    %99 = vector.load %arg6[%c0_61, %c0_62, %c0_63] : memref<9x128x128xbf16, #tpu.memory_space<vmem>>, vector<1x128x128xbf16>
    %100 = vector.shape_cast %99 : vector<1x128x128xbf16> to vector<128x128xbf16>
    %cst_64 = arith.constant dense<0.000000e+00> : vector<1x128xf32>
    %101 = tpu.matmul %98, %100, %cst_64 {dimension_numbers = #tpu.dot_dimension_numbers<[1], [0], [0], [1], [0, 0, 1, 1], [], []>} : vector<1x128xbf16>, vector<128x128xbf16>, vector<1x128xf32> -> vector<1x128xf32>
    %102 = arith.addf %96, %101 : vector<1x128xf32>
    %103 = vector.extract_strided_slice %95 {offsets = [1, 0], sizes = [1, 128], strides = [1, 1]} : vector<16x128xf32> to vector<1x128xf32>
    %104 = arith.truncf %103 : vector<1x128xf32> to vector<1x128xbf16>
    %c1_65 = arith.constant 1 : index
    %c0_66 = arith.constant 0 : index
    %c0_67 = arith.constant 0 : index
    %105 = vector.load %arg6[%c1_65, %c0_66, %c0_67] : memref<9x128x128xbf16, #tpu.memory_space<vmem>>, vector<1x128x128xbf16>
    %106 = vector.shape_cast %105 : vector<1x128x128xbf16> to vector<128x128xbf16>
    %cst_68 = arith.constant dense<0.000000e+00> : vector<1x128xf32>
    %107 = tpu.matmul %104, %106, %cst_68 {dimension_numbers = #tpu.dot_dimension_numbers<[1], [0], [0], [1], [0, 0, 1, 1], [], []>} : vector<1x128xbf16>, vector<128x128xbf16>, vector<1x128xf32> -> vector<1x128xf32>
    %108 = arith.addf %102, %107 : vector<1x128xf32>
    %109 = vector.extract_strided_slice %95 {offsets = [2, 0], sizes = [1, 128], strides = [1, 1]} : vector<16x128xf32> to vector<1x128xf32>
    %110 = arith.truncf %109 : vector<1x128xf32> to vector<1x128xbf16>
    %c2_69 = arith.constant 2 : index
    %c0_70 = arith.constant 0 : index
    %c0_71 = arith.constant 0 : index
    %111 = vector.load %arg6[%c2_69, %c0_70, %c0_71] : memref<9x128x128xbf16, #tpu.memory_space<vmem>>, vector<1x128x128xbf16>
    %112 = vector.shape_cast %111 : vector<1x128x128xbf16> to vector<128x128xbf16>
    %cst_72 = arith.constant dense<0.000000e+00> : vector<1x128xf32>
    %113 = tpu.matmul %110, %112, %cst_72 {dimension_numbers = #tpu.dot_dimension_numbers<[1], [0], [0], [1], [0, 0, 1, 1], [], []>} : vector<1x128xbf16>, vector<128x128xbf16>, vector<1x128xf32> -> vector<1x128xf32>
    %114 = arith.addf %108, %113 : vector<1x128xf32>
    %115 = vector.extract_strided_slice %95 {offsets = [3, 0], sizes = [1, 128], strides = [1, 1]} : vector<16x128xf32> to vector<1x128xf32>
    %116 = arith.truncf %115 : vector<1x128xf32> to vector<1x128xbf16>
    %c3_73 = arith.constant 3 : index
    %c0_74 = arith.constant 0 : index
    %c0_75 = arith.constant 0 : index
    %117 = vector.load %arg6[%c3_73, %c0_74, %c0_75] : memref<9x128x128xbf16, #tpu.memory_space<vmem>>, vector<1x128x128xbf16>
    %118 = vector.shape_cast %117 : vector<1x128x128xbf16> to vector<128x128xbf16>
    %cst_76 = arith.constant dense<0.000000e+00> : vector<1x128xf32>
    %119 = tpu.matmul %116, %118, %cst_76 {dimension_numbers = #tpu.dot_dimension_numbers<[1], [0], [0], [1], [0, 0, 1, 1], [], []>} : vector<1x128xbf16>, vector<128x128xbf16>, vector<1x128xf32> -> vector<1x128xf32>
    %120 = arith.addf %114, %119 : vector<1x128xf32>
    %121 = vector.extract_strided_slice %95 {offsets = [4, 0], sizes = [1, 128], strides = [1, 1]} : vector<16x128xf32> to vector<1x128xf32>
    %122 = arith.truncf %121 : vector<1x128xf32> to vector<1x128xbf16>
    %c4_77 = arith.constant 4 : index
    %c0_78 = arith.constant 0 : index
    %c0_79 = arith.constant 0 : index
    %123 = vector.load %arg6[%c4_77, %c0_78, %c0_79] : memref<9x128x128xbf16, #tpu.memory_space<vmem>>, vector<1x128x128xbf16>
    %124 = vector.shape_cast %123 : vector<1x128x128xbf16> to vector<128x128xbf16>
    %cst_80 = arith.constant dense<0.000000e+00> : vector<1x128xf32>
    %125 = tpu.matmul %122, %124, %cst_80 {dimension_numbers = #tpu.dot_dimension_numbers<[1], [0], [0], [1], [0, 0, 1, 1], [], []>} : vector<1x128xbf16>, vector<128x128xbf16>, vector<1x128xf32> -> vector<1x128xf32>
    %126 = arith.addf %120, %125 : vector<1x128xf32>
    %127 = vector.extract_strided_slice %95 {offsets = [5, 0], sizes = [1, 128], strides = [1, 1]} : vector<16x128xf32> to vector<1x128xf32>
    %128 = arith.truncf %127 : vector<1x128xf32> to vector<1x128xbf16>
    %c5_81 = arith.constant 5 : index
    %c0_82 = arith.constant 0 : index
    %c0_83 = arith.constant 0 : index
    %129 = vector.load %arg6[%c5_81, %c0_82, %c0_83] : memref<9x128x128xbf16, #tpu.memory_space<vmem>>, vector<1x128x128xbf16>
    %130 = vector.shape_cast %129 : vector<1x128x128xbf16> to vector<128x128xbf16>
    %cst_84 = arith.constant dense<0.000000e+00> : vector<1x128xf32>
    %131 = tpu.matmul %128, %130, %cst_84 {dimension_numbers = #tpu.dot_dimension_numbers<[1], [0], [0], [1], [0, 0, 1, 1], [], []>} : vector<1x128xbf16>, vector<128x128xbf16>, vector<1x128xf32> -> vector<1x128xf32>
    %132 = arith.addf %126, %131 : vector<1x128xf32>
    %133 = vector.extract_strided_slice %95 {offsets = [6, 0], sizes = [1, 128], strides = [1, 1]} : vector<16x128xf32> to vector<1x128xf32>
    %134 = arith.truncf %133 : vector<1x128xf32> to vector<1x128xbf16>
    %c6_85 = arith.constant 6 : index
    %c0_86 = arith.constant 0 : index
    %c0_87 = arith.constant 0 : index
    %135 = vector.load %arg6[%c6_85, %c0_86, %c0_87] : memref<9x128x128xbf16, #tpu.memory_space<vmem>>, vector<1x128x128xbf16>
    %136 = vector.shape_cast %135 : vector<1x128x128xbf16> to vector<128x128xbf16>
    %cst_88 = arith.constant dense<0.000000e+00> : vector<1x128xf32>
    %137 = tpu.matmul %134, %136, %cst_88 {dimension_numbers = #tpu.dot_dimension_numbers<[1], [0], [0], [1], [0, 0, 1, 1], [], []>} : vector<1x128xbf16>, vector<128x128xbf16>, vector<1x128xf32> -> vector<1x128xf32>
    %138 = arith.addf %132, %137 : vector<1x128xf32>
    %139 = vector.extract_strided_slice %95 {offsets = [7, 0], sizes = [1, 128], strides = [1, 1]} : vector<16x128xf32> to vector<1x128xf32>
    %140 = arith.truncf %139 : vector<1x128xf32> to vector<1x128xbf16>
    %c7_89 = arith.constant 7 : index
    %c0_90 = arith.constant 0 : index
    %c0_91 = arith.constant 0 : index
    %141 = vector.load %arg6[%c7_89, %c0_90, %c0_91] : memref<9x128x128xbf16, #tpu.memory_space<vmem>>, vector<1x128x128xbf16>
    %142 = vector.shape_cast %141 : vector<1x128x128xbf16> to vector<128x128xbf16>
    %cst_92 = arith.constant dense<0.000000e+00> : vector<1x128xf32>
    %143 = tpu.matmul %140, %142, %cst_92 {dimension_numbers = #tpu.dot_dimension_numbers<[1], [0], [0], [1], [0, 0, 1, 1], [], []>} : vector<1x128xbf16>, vector<128x128xbf16>, vector<1x128xf32> -> vector<1x128xf32>
    %144 = arith.addf %138, %143 : vector<1x128xf32>
    %145 = vector.extract_strided_slice %95 {offsets = [8, 0], sizes = [1, 128], strides = [1, 1]} : vector<16x128xf32> to vector<1x128xf32>
    %146 = arith.truncf %145 : vector<1x128xf32> to vector<1x128xbf16>
    %c8_93 = arith.constant 8 : index
    %c0_94 = arith.constant 0 : index
    %c0_95 = arith.constant 0 : index
    %147 = vector.load %arg6[%c8_93, %c0_94, %c0_95] : memref<9x128x128xbf16, #tpu.memory_space<vmem>>, vector<1x128x128xbf16>
    %148 = vector.shape_cast %147 : vector<1x128x128xbf16> to vector<128x128xbf16>
    %cst_96 = arith.constant dense<0.000000e+00> : vector<1x128xf32>
    %149 = tpu.matmul %146, %148, %cst_96 {dimension_numbers = #tpu.dot_dimension_numbers<[1], [0], [0], [1], [0, 0, 1, 1], [], []>} : vector<1x128xbf16>, vector<128x128xbf16>, vector<1x128xf32> -> vector<1x128xf32>
    %150 = arith.addf %144, %149 : vector<1x128xf32>
    %c0_97 = arith.constant 0 : index
    %c0_98 = arith.constant 0 : index
    %151 = vector.load %arg7[%c0_97, %c0_98] : memref<1x128xf32, #tpu.memory_space<vmem>>, vector<1x128xf32>
    %152 = arith.addf %150, %151 : vector<1x128xf32>
    %cst_99 = arith.constant 0.000000e+00 : f32
    %153 = vector.broadcast %cst_99 : f32 to vector<1x128xf32>
    %154 = arith.maximumf %152, %153 : vector<1x128xf32>
    %155 = arith.truncf %154 : vector<1x128xf32> to vector<1x128xbf16>
    %c0_100 = arith.constant 0 : index
    %c0_101 = arith.constant 0 : index
    %156 = vector.load %arg8[%c0_100, %c0_101] : memref<128x512xbf16, #tpu.memory_space<vmem>>, vector<128x512xbf16>
    %cst_102 = arith.constant dense<0.000000e+00> : vector<1x512xf32>
    %157 = tpu.matmul %155, %156, %cst_102 {dimension_numbers = #tpu.dot_dimension_numbers<[1], [0], [0], [1], [0, 0, 1, 1], [], []>} : vector<1x128xbf16>, vector<128x512xbf16>, vector<1x512xf32> -> vector<1x512xf32>
    %c0_103 = arith.constant 0 : index
    %c0_104 = arith.constant 0 : index
    %158 = vector.load %arg9[%c0_103, %c0_104] : memref<1x512xf32, #tpu.memory_space<vmem>>, vector<1x512xf32>
    %159 = arith.addf %157, %158 : vector<1x512xf32>
    %cst_105 = arith.constant 0.000000e+00 : f32
    %160 = vector.broadcast %cst_105 : f32 to vector<1x512xf32>
    %161 = arith.maximumf %159, %160 : vector<1x512xf32>
    %162 = arith.truncf %161 : vector<1x512xf32> to vector<1x512xbf16>
    %c0_106 = arith.constant 0 : index
    %c0_107 = arith.constant 0 : index
    %163 = vector.load %arg10[%c0_106, %c0_107] : memref<512x128xbf16, #tpu.memory_space<vmem>>, vector<512x128xbf16>
    %cst_108 = arith.constant dense<0.000000e+00> : vector<1x128xf32>
    %164 = tpu.matmul %162, %163, %cst_108 {dimension_numbers = #tpu.dot_dimension_numbers<[1], [0], [0], [1], [0, 0, 1, 1], [], []>} : vector<1x512xbf16>, vector<512x128xbf16>, vector<1x128xf32> -> vector<1x128xf32>
    %c0_109 = arith.constant 0 : index
    %c0_110 = arith.constant 0 : index
    %165 = vector.load %arg11[%c0_109, %c0_110] : memref<1x128xf32, #tpu.memory_space<vmem>>, vector<1x128xf32>
    %166 = arith.addf %164, %165 : vector<1x128xf32>
    %167 = vector.shape_cast %166 : vector<1x128xf32> to vector<1x1x128xf32>
    %168 = vector.broadcast %167 : vector<1x1x128xf32> to vector<1x8x128xf32>
    %c0_111 = arith.constant 0 : index
    %c0_112 = arith.constant 0 : index
    %c0_113 = arith.constant 0 : index
    %169 = vector.load %arg12[%c0_111, %c0_112, %c0_113] : memref<1x8x128xf32, #tpu.memory_space<vmem>>, vector<1x8x128xf32>
    tpu.vector_store %arg12[%c0_111, %c0_112, %c0_113], %168 {strides = array<i32>} : memref<1x8x128xf32, #tpu.memory_space<vmem>>, vector<1x8x128xf32>,
    return
  }
  func.func @transform_0(%arg0: i32) -> (i32, i32, i32) {
    %c0_i32 = arith.constant 0 : i32
    %c0_i32_0 = arith.constant 0 : i32
    %c0_i32_1 = arith.constant 0 : i32
    return %arg0, %c0_i32, %c0_i32_0 : i32, i32, i32
  }
  func.func @transform_1(%arg0: i32) -> (i32, i32) {
    %c0_i32 = arith.constant 0 : i32
    %c0_i32_0 = arith.constant 0 : i32
    %c0_i32_1 = arith.constant 0 : i32
    return %c0_i32, %c0_i32_0 : i32, i32
  }
  func.func @transform_2(%arg0: i32) -> (i32, i32) {
    %c0_i32 = arith.constant 0 : i32
    %c0_i32_0 = arith.constant 0 : i32
    %c0_i32_1 = arith.constant 0 : i32
    return %c0_i32, %c0_i32_0 : i32, i32
  }
  func.func @transform_3(%arg0: i32) -> (i32, i32, i32) {
    %c0_i32 = arith.constant 0 : i32
    %c0_i32_0 = arith.constant 0 : i32
    %c0_i32_1 = arith.constant 0 : i32
    %c0_i32_2 = arith.constant 0 : i32
    return %c0_i32, %c0_i32_0, %c0_i32_1 : i32, i32, i32
  }
  func.func @transform_4(%arg0: i32) -> (i32, i32) {
    %c0_i32 = arith.constant 0 : i32
    %c0_i32_0 = arith.constant 0 : i32
    %c0_i32_1 = arith.constant 0 : i32
    return %c0_i32, %c0_i32_0 : i32, i32
  }
  func.func @transform_5(%arg0: i32) -> (i32, i32, i32) {
    %c0_i32 = arith.constant 0 : i32
    %c0_i32_0 = arith.constant 0 : i32
    %c0_i32_1 = arith.constant 0 : i32
    %c0_i32_2 = arith.constant 0 : i32
    return %c0_i32, %c0_i32_0, %c0_i32_1 : i32, i32, i32
  }
  func.func @transform_6(%arg0: i32) -> (i32, i32) {
    %c0_i32 = arith.constant 0 : i32
    %c0_i32_0 = arith.constant 0 : i32
    %c0_i32_1 = arith.constant 0 : i32
    return %c0_i32, %c0_i32_0 : i32, i32
  }
  func.func @transform_7(%arg0: i32) -> (i32, i32) {
    %c0_i32 = arith.constant 0 : i32
    %c0_i32_0 = arith.constant 0 : i32
    %c0_i32_1 = arith.constant 0 : i32
    return %c0_i32, %c0_i32_0 : i32, i32
  }
  func.func @transform_8(%arg0: i32) -> (i32, i32) {
    %c0_i32 = arith.constant 0 : i32
    %c0_i32_0 = arith.constant 0 : i32
    %c0_i32_1 = arith.constant 0 : i32
    return %c0_i32, %c0_i32_0 : i32, i32
  }
  func.func @transform_9(%arg0: i32) -> (i32, i32) {
    %c0_i32 = arith.constant 0 : i32
    %c0_i32_0 = arith.constant 0 : i32
    %c0_i32_1 = arith.constant 0 : i32
    return %c0_i32, %c0_i32_0 : i32, i32
  }
  func.func @transform_10(%arg0: i32) -> (i32, i32) {
    %c0_i32 = arith.constant 0 : i32
    %c0_i32_0 = arith.constant 0 : i32
    %c0_i32_1 = arith.constant 0 : i32
    return %c0_i32, %c0_i32_0 : i32, i32
  }
  func.func @transform_11(%arg0: i32) -> (i32, i32, i32) {
    %c0_i32 = arith.constant 0 : i32
    %c0_i32_0 = arith.constant 0 : i32
    %c0_i32_1 = arith.constant 0 : i32
    return %arg0, %c0_i32, %c0_i32_0 : i32, i32, i32
  }
}

</mosaic_0001>

<bundles_post_ra>
// kernel: dqn_forward.1
= control target key start
LH: loop header
LB: loop body
LE: loop exit
PB: predicated region body
PF: predicated region fallthrough
CT: control target
= control target key end

     0   :  { %s5721_s17 = smov 0   ;;  %s6833_s0 = inlined_call_operand.vmem [shape: bf16[2,256,256], index: 0, kind: input, shape index: {}]   ;;  %s6834_s1 = inlined_call_operand.vmem [shape: bf16[256,128], index: 1, kind: input, shape index: {}]   ;;  %s6835_s2 = inlined_call_operand.vmem [shape: f32[1,128], index: 2, kind: input, shape index: {}]   ;;  %s6836_s3 = inlined_call_operand.vmem [shape: bf16[16,128,128], index: 3, kind: input, shape index: {}]   ;;  %s6837_s4 = inlined_call_operand.vmem [shape: f32[1,128], index: 4, kind: input, shape index: {}]   ;;  %s6838_s5 = inlined_call_operand.vmem [shape: bf16[9,128,128], index: 5, kind: input, shape index: {}]   ;;  %s6839_s6 = inlined_call_operand.vmem [shape: f32[1,128], index: 6, kind: input, shape index: {}]   ;;  %s6840_s7 = inlined_call_operand.vmem [shape: bf16[128,512], index: 7, kind: input, shape index: {}]   ;;  %s6841_s8 = inlined_call_operand.vmem [shape: f32[1,512], index: 8, kind: input, shape index: {}]   ;;  %s6842_s9 = inlined_call_operand.vmem [shape: bf16[512,128], index: 9, kind: input, shape index: {}]   ;;  %s6843_s10 = inlined_call_operand.vmem [shape: f32[1,128], index: 10, kind: input, shape index: {}]   ;;  %s6844_s11 = inlined_call_operand.vmem [shape: f32[2,8,128], index: 11, kind: output, shape index: {}]  }
   0x1 LB: > { %s3703_s18 = sadd.s32 4294967295, %s5659_s17   ;;  %p3707_p0 = scmp.ge.s32.totalorder %s5659_s17, 1  ;;  %s5659_s17 = sphi %s5721_s17, %s21_s17  }
   0x2   : > { %p337_p1 = scmp.lt.s32.totalorder %s5659_s17, 3 }
   0x4   : > { %p338_p2 = pnand %p3707_p0, %p337_p1 }
   0x5   : > { %p376_p3 = scmp.lt.s32.totalorder (!%p338_p2), %s3703_s18, 1 }
   0x6   : > { %341 = sbr.rel (%p338_p2) target bundleno = 1016 (0x3f8), region = 64 }
   0xb   : > { %v5369_v0 = vld [vmem:[%s6834_s1 + $0x38] sm:$0xff]  ;;  %v5368_v2 = vld [vmem:[%s6834_s1 + $0x30] sm:$0xff]  ;;  %v5367_v4 = vld [vmem:[%s6834_s1 + $0x28] sm:$0xff]  ;;  %s6846_s18 = smov (!%p376_p3, %s3703_s18), 1 }
   0xc   : > { %v5377_v1 = vld [vmem:[%s6834_s1 + $0x78] sm:$0xff]  ;;  %709 = vmatpush.bf16.msra.mxu0 %v5369_v0  ;;  %v5376_v3 = vld [vmem:[%s6834_s1 + $0x70] sm:$0xff]  ;;  %v5375_v5 = vld [vmem:[%s6834_s1 + $0x68] sm:$0xff]  ;;  %s5329_s26 = sshll.u32 %s6846_s18, 8  ;;  %s3710_s22 = sshll.u32 %s6846_s18, 3 }
   0xd   : > { %798 = vmatpush.bf16.msra.mxu1 %v5377_v1  ;;  %v5366_v6 = vld [vmem:[%s6834_s1 + $0x20] sm:$0xff]  ;;  %v5365_v8 = vld [vmem:[%s6834_s1 + $0x18] sm:$0xff]  ;;  %v5364_v10 = vld [vmem:[%s6834_s1 + $0x10] sm:$0xff]  ;;  %s5777_s14 = scalar_lea.vmem %s6833_s0, %s5329_s26 }
   0xe   : > { %v5374_v7 = vld [vmem:[%s6834_s1 + $0x60] sm:$0xff]  ;;  %v5373_v9 = vld [vmem:[%s6834_s1 + $0x58] sm:$0xff]  ;;  %v5372_v11 = vld [vmem:[%s6834_s1 + $0x50] sm:$0xff] }
   0xf   : > { %v5363_v12 = vld [vmem:[%s6834_s1 + $0x8] sm:$0xff]  ;;  %v5362_v14 = vld [vmem:[%s6834_s1] sm:$0xff]  ;;  %v3721_v22 = vld [vmem:[%s5777_s14 + $0x10] sm:$0xf] }
  0x10   : > { %710 = vmatpush.bf16.msra.mxu0 %v5368_v2  ;;  %v5371_v13 = vld [vmem:[%s6834_s1 + $0x48] sm:$0xff]  ;;  %v5370_v15 = vld [vmem:[%s6834_s1 + $0x40] sm:$0xff]  ;;  %v5333_v23 = vld [vmem:[%s5777_s14 + $0x14] sm:$0xf0] }
  0x11   : > { %799 = vmatpush.bf16.msra.mxu1 %v5376_v3  ;;  %v3713_v16 = vld [vmem:[%s5777_s14] sm:$0xf]  ;;  %v5331_v17 = vld [vmem:[%s5777_s14 + $0x4] sm:$0xf0]  ;;  %v5330_v18 = vld [vmem:[%s5777_s14 + $0x4] sm:$0xf]  ;;  %v3722_v26 = vor.u32 %v5333_v23, %v3721_v22 }
  0x12   : > { %v3715_v19 = vld [vmem:[%s5777_s14 + $0x8] sm:$0xf0]  ;;  %v3714_v20 = vor.u32 %v5331_v17, %v3713_v16  ;;  %v5332_v24 = vld [vmem:[%s5777_s14 + $0x14] sm:$0xf]  ;;  %v3723_v25 = vld [vmem:[%s5777_s14 + $0x18] sm:$0xf0] }
  0x13   : > { %v3718_v21 = vor.u32 %v5330_v18, %v3715_v19  ;;  %v3726_v27 = vor.u32 %v5332_v24, %v3723_v25  ;;  %v3729_v28 = vld [vmem:[%s5777_s14 + $0x20] sm:$0xf]  ;;  %v5335_v29 = vld [vmem:[%s5777_s14 + $0x24] sm:$0xf0]  ;;  %v5334_v30 = vld [vmem:[%s5777_s14 + $0x24] sm:$0xf] }
  0x14   : > { %711 = vmatpush.bf16.msra.mxu0 %v5367_v4  ;;  %v3731_v31 = vld [vmem:[%s5777_s14 + $0x28] sm:$0xf0]  ;;  %v3730_v32 = vor.u32 %v5335_v29, %v3729_v28  ;;  %v3737_v34 = vld [vmem:[%s5777_s14 + $0x30] sm:$0xf]  ;;  %v5337_v35 = vld [vmem:[%s5777_s14 + $0x34] sm:$0xf0] }
  0x15   : > { %800 = vmatpush.bf16.msra.mxu1 %v5375_v5  ;;  %v3734_v33 = vor.u32 %v5334_v30, %v3731_v31  ;;  %v5336_v36 = vld [vmem:[%s5777_s14 + $0x34] sm:$0xf]  ;;  %v3739_v37 = vld [vmem:[%s5777_s14 + $0x38] sm:$0xf0]  ;;  %v3738_v38 = vor.u32 %v5337_v35, %v3737_v34  ;;  %v3745_v40 = vld [vmem:[%s5777_s14 + $0x40] sm:$0xf] }
  0x16   : > { %v3742_v39 = vor.u32 %v5336_v36, %v3739_v37  ;;  %v5339_v41 = vld [vmem:[%s5777_s14 + $0x44] sm:$0xf0]  ;;  %v5338_v42 = vld [vmem:[%s5777_s14 + $0x44] sm:$0xf]  ;;  %v3747_v43 = vld [vmem:[%s5777_s14 + $0x48] sm:$0xf0] }
  0x17   : > { %v3746_v44 = vor.u32 %v5339_v41, %v3745_v40  ;;  %v3750_v45 = vor.u32 %v5338_v42, %v3747_v43  ;;  %v3753_v46 = vld [vmem:[%s5777_s14 + $0x50] sm:$0xf]  ;;  %v5341_v47 = vld [vmem:[%s5777_s14 + $0x54] sm:$0xf0]  ;;  %v5340_v48 = vld [vmem:[%s5777_s14 + $0x54] sm:$0xf] }
  0x18   : > { %712 = vmatpush.bf16.msra.mxu0 %v5366_v6  ;;  %v3755_v49 = vld [vmem:[%s5777_s14 + $0x58] sm:$0xf0]  ;;  %v3754_v50 = vor.u32 %v5341_v47, %v3753_v46  ;;  %v5384_v54 = vld [vmem:[%s6836_s3 + $0x30] sm:$0xff]  ;;  %v5383_v56 = vld [vmem:[%s6836_s3 + $0x28] sm:$0xff] }
  0x19   : > { %801 = vmatpush.bf16.msra.mxu1 %v5374_v7  ;;  %v3758_v51 = vor.u32 %v5340_v48, %v3755_v49  ;;  %v5385_v52 = vld [vmem:[%s6836_s3 + $0x38] sm:$0xff]  ;;  %v5392_v55 = vld [vmem:[%s6836_s3 + $0x70] sm:$0xff]  ;;  %v3761_v57 = vld [vmem:[%s5777_s14 + $0x60] sm:$0xf] }
  0x1a   : > { %v5393_v53 = vld [vmem:[%s6836_s3 + $0x78] sm:$0xff]  ;;  %1106 = vmatpush.bf16.msra.mxu3 %v5385_v52  ;;  %v5343_v58 = vld [vmem:[%s5777_s14 + $0x64] sm:$0xf0]  ;;  %v5342_v59 = vld [vmem:[%s5777_s14 + $0x64] sm:$0xf] }
  0x1b   : > { %1038 = vmatpush.bf16.msra.mxu2 %v5393_v53  ;;  %v3763_v60 = vld [vmem:[%s5777_s14 + $0x68] sm:$0xf0]  ;;  %v3762_v61 = vor.u32 %v5343_v58, %v3761_v57  ;;  %v5382_v0 = vld [vmem:[%s6836_s3 + $0x20] sm:$0xff]  ;;  %v5381_v2 = vld [vmem:[%s6836_s3 + $0x18] sm:$0xff] }
  0x1c   : > { %713 = vmatpush.bf16.msra.mxu0 %v5365_v8  ;;  %v3766_v62 = vor.u32 %v5342_v59, %v3763_v60  ;;  %v5391_v63 = vld [vmem:[%s6836_s3 + $0x68] sm:$0xff]  ;;  %v5390_v1 = vld [vmem:[%s6836_s3 + $0x60] sm:$0xff]  ;;  %v5389_v3 = vld [vmem:[%s6836_s3 + $0x58] sm:$0xff] }
  0x1d   : > { %802 = vmatpush.bf16.msra.mxu1 %v5373_v9  ;;  %v5380_v4 = vld [vmem:[%s6836_s3 + $0x10] sm:$0xff]  ;;  %v5345_v6 = vld [vmem:[%s5777_s14 + $0x74] sm:$0xf0]  ;;  %v3771_v9 = vld [vmem:[%s5777_s14 + $0x78] sm:$0xf0] }
  0x1e   : > { %1107 = vmatpush.bf16.msra.mxu3 %v5384_v54  ;;  %v3769_v5 = vld [vmem:[%s5777_s14 + $0x70] sm:$0xf]  ;;  %v5344_v8 = vld [vmem:[%s5777_s14 + $0x74] sm:$0xf]  ;;  %v5401_v16 = vld [vmem:[%s6836_s3 + $0xb8] sm:$0xff] }
  0x1f   : > { %1039 = vmatpush.bf16.msra.mxu2 %v5392_v55  ;;  %v5388_v7 = vld [vmem:[%s6836_s3 + $0x50] sm:$0xff]  ;;  %v3777_v18 = vld [vmem:[%s5777_s14 + $0x80] sm:$0xf]  ;;  %v5347_v19 = vld [vmem:[%s5777_s14 + $0x84] sm:$0xf0] }
  0x20   : > { %714 = vmatpush.bf16.msra.mxu0 %v5364_v10  ;;  %v5379_v10 = vld [vmem:[%s6836_s3 + $0x8] sm:$0xff]  ;;  %v5400_v17 = vld [vmem:[%s6836_s3 + $0xb0] sm:$0xff]  ;;  %v5881_v23 = vld [vmem:[%s6835_s2] ss:$0 sm:$0xff]  ;;  %v3778_v24 = vor.u32 %v5347_v19, %v3777_v18 }
  0x21   : > { %803 = vmatpush.bf16.msra.mxu1 %v5372_v11  ;;  %v3770_v11 = vor.u32 %v5345_v6, %v3769_v5  ;;  %v5399_v22 = vld [vmem:[%s6836_s3 + $0xa8] sm:$0xff]  ;;  %v5398_v28 = vld [vmem:[%s6836_s3 + $0xa0] sm:$0xff]  ;;  %v5397_v30 = vld [vmem:[%s6836_s3 + $0x98] sm:$0xff] }
  0x22   : > { %1108 = vmatpush.bf16.msra.mxu3 %v5383_v56  ;;  %v5409_v31 = vld [vmem:[%s6836_s3 + $0xf8] sm:$0xff]  ;;  %v5396_v35 = vld [vmem:[%s6836_s3 + $0x90] sm:$0xff]  ;;  %v5394_v53 = vld [vmem:[%s6836_s3 + $0x80] sm:$0xff] }
  0x23   : > { %1040 = vmatpush.bf16.msra.mxu2 %v5391_v63  ;;  %v5408_v36 = vld [vmem:[%s6836_s3 + $0xf0] sm:$0xff]  ;;  %v5349_v41 = vld [vmem:[%s5777_s14 + $0x94] sm:$0xf0]  ;;  %v3787_v43 = vld [vmem:[%s5777_s14 + $0x98] sm:$0xf0] }
  0x24   : > { %715 = vmatpush.bf16.msra.mxu0 %v5363_v12  ;;  %v3774_v12 = vor.u32 %v5344_v8, %v3771_v9  ;;  %v3785_v40 = vld [vmem:[%s5777_s14 + $0x90] sm:$0xf]  ;;  %v5348_v42 = vld [vmem:[%s5777_s14 + $0x94] sm:$0xf]  ;;  %v5406_v54 = vld [vmem:[%s6836_s3 + $0xe0] sm:$0xff] }
  0x25   : > { %804 = vmatpush.bf16.msra.mxu1 %v5371_v13  ;;  %v5387_v13 = vld [vmem:[%s6836_s3 + $0x48] sm:$0xff]  ;;  %v3786_v49 = vor.u32 %v5349_v41, %v3785_v40  ;;  %v5405_v59 = vld [vmem:[%s6836_s3 + $0xd8] sm:$0xff]  ;;  %v5404_v63 = vld [vmem:[%s6836_s3 + $0xd0] sm:$0xff] }
  0x26   : > { %1109 = vmatpush.bf16.msra.mxu3 %v5382_v0  ;;  %v5350_v5 = vld [vmem:[%s5777_s14 + $0xa4] sm:$0xf]  ;;  %v3795_v6 = vld [vmem:[%s5777_s14 + $0xa8] sm:$0xf0]  ;;  %v5417_v19 = vld [vmem:[%s6836_s3 + $0x138] sm:$0xff] }
  0x27   : > { %1041 = vmatpush.bf16.msra.mxu2 %v5390_v1 }
  0x28   : > { %716 = vmatpush.bf16.msra.mxu0 %v5362_v14  ;;  %v5378_v14 = vld [vmem:[%s6836_s3] sm:$0xff] }
  0x29   : > { %805 = vmatpush.bf16.msra.mxu1 %v5370_v15  ;;  %v5386_v15 = vld [vmem:[%s6836_s3 + $0x40] sm:$0xff] }
  0x2a   : > { %1110 = vmatpush.bf16.msra.mxu3 %v5381_v2 }
  0x2b   : > { %717 = vmatmul.bf16.vlgmr.msra.gmra.mxu0 %v3714_v20  ;;  %1042 = vmatpush.bf16.msra.mxu2 %v5389_v3  ;;  %v5346_v20 = vld [vmem:[%s5777_s14 + $0x84] sm:$0xf]  ;;  %v3793_v3 = vld [vmem:[%s5777_s14 + $0xa0] sm:$0xf] }
  0x2c   : > { %806 = vmatmul.bf16.vlgmr.msra.gmra.mxu1 %v3718_v21  ;;  %v3779_v21 = vld [vmem:[%s5777_s14 + $0x88] sm:$0xf0] }
  0x2d   : > { %v3782_v25 = vor.u32 %v5346_v20, %v3779_v21  ;;  %v5425_v21 = vld [vmem:[%s6836_s3 + $0x178] sm:$0xff] }
  0x2e   : > { %1111 = vmatpush.bf16.msra.mxu3 %v5380_v4  ;;  %v5351_v4 = vld [vmem:[%s5777_s14 + $0xa4] sm:$0xf0] }
  0x2f   : > { %1043 = vmatpush.bf16.msra.mxu2 %v5388_v7  ;;  %v5403_v7 = vld [vmem:[%s6836_s3 + $0xc8] sm:$0xff] }
  0x32   : > { %1112 = vmatpush.bf16.msra.mxu3 %v5379_v10 }
  0x33   : > { %1044 = vmatpush.bf16.msra.mxu2 %v5387_v13 }
  0x36   : > { %1113 = vmatpush.bf16.msra.mxu3 %v5378_v14 }
  0x37   : > { %1045 = vmatpush.bf16.msra.mxu2 %v5386_v15  ;;  %v5402_v15 = vld [vmem:[%s6836_s3 + $0xc0] sm:$0xff] }
  0x3a   : > { %1278 = vmatpush.bf16.msrb.mxu3 %v5409_v31 }
  0x3b   : > { %722 = vmatmul.bf16.gmra.mxu0 %v3722_v26  ;;  %1191 = vmatpush.bf16.msrb.mxu2 %v5401_v16 }
  0x3c   : > { %811 = vmatmul.bf16.gmra.mxu1 %v3726_v27 }
  0x3e   : > { %1279 = vmatpush.bf16.msrb.mxu3 %v5408_v36  ;;  %v5423_v36 = vld [vmem:[%s6836_s3 + $0x168] sm:$0xff] }
  0x3f   : > { %1192 = vmatpush.bf16.msrb.mxu2 %v5400_v17 }
  0x43   : > { %1193 = vmatpush.bf16.msrb.mxu2 %v5399_v22 }
  0x47   : > { %1194 = vmatpush.bf16.msrb.mxu2 %v5398_v28 }
  0x4b   : > { %727 = vmatmul.bf16.gmra.mxu0 %v3730_v32  ;;  %1195 = vmatpush.bf16.msrb.mxu2 %v5397_v30  ;;  %v5415_v30 = vld [vmem:[%s6836_s3 + $0x128] sm:$0xff] }
  0x4c   : > { %816 = vmatmul.bf16.gmra.mxu1 %v3734_v33 }
  0x4f   : > { %1196 = vmatpush.bf16.msrb.mxu2 %v5396_v35  ;;  %v3803_v35 = vld [vmem:[%s5777_s14 + $0xb8] sm:$0xf0] }
  0x5b   : > { %732 = vmatmul.bf16.gmra.mxu0 %v3738_v38 }
  0x5c   : > { %821 = vmatmul.bf16.gmra.mxu1 %v3742_v39 }
  0x6b   : > { %737 = vmatmul.bf16.gmra.mxu0 %v3746_v44  ;;  %v5395_v44 = vld [vmem:[%s6836_s3 + $0x88] sm:$0xff] }
  0x6c   : > { %826 = vmatmul.bf16.gmra.mxu1 %v3750_v45  ;;  %v5407_v45 = vld [vmem:[%s6836_s3 + $0xe8] sm:$0xff]  ;;  %1197 = vmatpush.bf16.msrb.mxu2 %v5395_v44 }
  0x6d   : > { %1280 = vmatpush.bf16.msrb.mxu3 %v5407_v45  ;;  %v5422_v45 = vld [vmem:[%s6836_s3 + $0x160] sm:$0xff] }
  0x70   : > { %1198 = vmatpush.bf16.msrb.mxu2 %v5394_v53  ;;  %v5412_v53 = vld [vmem:[%s6836_s3 + $0x110] sm:$0xff] }
  0x71   : > { %1281 = vmatpush.bf16.msrb.mxu3 %v5406_v54 }
  0x75   : > { %1282 = vmatpush.bf16.msrb.mxu3 %v5405_v59  ;;  %v5411_v59 = vld [vmem:[%s6836_s3 + $0x108] sm:$0xff] }
  0x79   : > { %1283 = vmatpush.bf16.msrb.mxu3 %v5404_v63  ;;  %v5354_v63 = vld [vmem:[%s5777_s14 + $0xc4] sm:$0xf] }
  0x7b   : > { %742 = vmatmul.bf16.gmra.mxu0 %v3754_v50  ;;  %v3790_v50 = vor.u32 %v5348_v42, %v3787_v43 }
  0x7c   : > { %831 = vmatmul.bf16.gmra.mxu1 %v3758_v51 }
  0x7d   : > { %1284 = vmatpush.bf16.msrb.mxu3 %v5403_v7 }
  0x81   : > { %1285 = vmatpush.bf16.msrb.mxu3 %v5402_v15 }
  0x8b   : > { %747 = vmatmul.bf16.gmra.mxu0 %v3762_v61 }
  0x8c   : > { %836 = vmatmul.bf16.gmra.mxu1 %v3766_v62 }
  0x9b   : > { %752 = vmatmul.bf16.gmra.mxu0 %v3770_v11  ;;  %v3794_v11 = vor.u32 %v5351_v4, %v3793_v3  ;;  %v5410_v4 = vld [vmem:[%s6836_s3 + $0x100] sm:$0xff] }
  0x9c   : > { %841 = vmatmul.bf16.gmra.mxu1 %v3774_v12  ;;  %v3798_v12 = vor.u32 %v5350_v5, %v3795_v6 }
  0xa8   : > { %v718_v26 = vpop.f32.mrf.mxu0 }
  0xa9   : > { %v807_v27 = vpop.f32.mrf.mxu1  ;;  %v719_v29 = vadd.f32 %v5881_v23, %v718_v26 }
  0xab   : > { %757 = vmatmul.bf16.gmra.mxu0 %v3778_v24  ;;  %v808_v32 = vadd.f32 %v807_v27, %v719_v29  ;;  %v5416_v24 = vld [vmem:[%s6836_s3 + $0x130] sm:$0xff] }
  0xac   : > { %846 = vmatmul.bf16.gmra.mxu1 %v3782_v25  ;;  %v5424_v27 = vld [vmem:[%s6836_s3 + $0x170] sm:$0xff] }
  0xad   : > { %v887_v37 = vmax.f32 %v808_v32, 0.0  ;;  %v3801_v32 = vld [vmem:[%s5777_s14 + $0xb0] sm:$0xf] }
  0xaf   : > { %v919_v46 = vpack.c.bf16 %v887_v37, %v887_v37 }
  0xb0   : > { %v720_v33 = vpop.f32.mrf.mxu0 }
  0xb1   : > { %v809_v34 = vpop.f32.mrf.mxu1  ;;  %v721_v38 = vadd.f32 %v5881_v23, %v720_v33  ;;  %v1054_v55 = vunpack.c.l.b16 %v919_v46  ;;  %v5353_v33 = vld [vmem:[%s5777_s14 + $0xb4] sm:$0xf0] }
  0xb2   : > { %v3802_v41 = vor.u32 %v5353_v33, %v3801_v32  ;;  %v5439_v32 = vld [vmem:[%s6836_s3 + $0x1e8] sm:$0xff] }
  0xb3   : > { %v810_v39 = vadd.f32 %v809_v34, %v721_v38  ;;  %v5352_v34 = vld [vmem:[%s5777_s14 + $0xb4] sm:$0xf] }
  0xb4   : > { %v3806_v42 = vor.u32 %v5352_v34, %v3803_v35 }
  0xb5   : > { %v888_v47 = vmax.f32 %v810_v39, 0.0  ;;  %v5414_v39 = vld [vmem:[%s6836_s3 + $0x120] sm:$0xff] }
  0xb7   : > { %v920_v48 = vpack.c.bf16 %v888_v47, %v888_v47 }
  0xb8   : > { %v723_v51 = vpop.f32.mrf.mxu0 }
  0xb9   : > { %v812_v52 = vpop.f32.mrf.mxu1  ;;  %v1055_v56 = vunpack.c.l.b16 %v920_v48  ;;  %v724_v57 = vadd.f32 %v5881_v23, %v723_v51  ;;  %v5421_v51 = vld [vmem:[%s6836_s3 + $0x158] sm:$0xff] }
  0xbb   : > { %762 = vmatmul.bf16.gmra.mxu0 %v3786_v49  ;;  %v1056_v58 = vpack.c.b16 %v1055_v56, %v1054_v55  ;;  %v813_v60 = vadd.f32 %v812_v52, %v724_v57  ;;  %v5413_v49 = vld [vmem:[%s6836_s3 + $0x118] sm:$0xff]  ;;  %v5420_v56 = vld [vmem:[%s6836_s3 + $0x150] sm:$0xff] }
  0xbc   : > { %851 = vmatmul.bf16.gmra.mxu1 %v3790_v50 }
  0xbd   : > { %1114 = vmatmul.bf16.vlgmr.msra.gmra.mxu3 %v1056_v58  ;;  %v889_v0 = vmax.f32 %v813_v60, 0.0 }
  0xbe   : > { %1452 = vmatpush.bf16.msra.mxu3 %v5425_v21  ;;  %v5431_v21 = vld [vmem:[%s6836_s3 + $0x1a8] sm:$0xff] }
  0xbf   : > { %v921_v8 = vpack.c.bf16 %v889_v0, %v889_v0  ;;  %v3811_v0 = vld [vmem:[%s5777_s14 + $0xc8] sm:$0xf0] }
  0xc0   : > { %v725_v61 = vpop.f32.mrf.mxu0  ;;  %v3814_v7 = vor.u32 %v5354_v63, %v3811_v0  ;;  %v5449_v0 = vld [vmem:[%s6836_s3 + $0x238] sm:$0xff] }
  0xc1   : > { %v814_v62 = vpop.f32.mrf.mxu1  ;;  %v726_v1 = vadd.f32 %v5881_v23, %v725_v61  ;;  %v986_v16 = vunpack.c.l.b16 %v921_v8  ;;  %v3809_v61 = vld [vmem:[%s5777_s14 + $0xc0] sm:$0xf] }
  0xc2   : > { %1453 = vmatpush.bf16.msra.mxu3 %v5424_v27  ;;  %v3817_v27 = vld [vmem:[%s5777_s14 + $0xd0] sm:$0xf] }
  0xc3   : > { %v815_v2 = vadd.f32 %v814_v62, %v726_v1  ;;  %v5355_v62 = vld [vmem:[%s5777_s14 + $0xc4] sm:$0xf0] }
  0xc4   : > { %v5419_v1 = vld [vmem:[%s6836_s3 + $0x148] sm:$0xff]  ;;  %v3810_v6 = vor.u32 %v5355_v62, %v3809_v61 }
  0xc5   : > { %v890_v9 = vmax.f32 %v815_v2, 0.0  ;;  %v5435_v61 = vld [vmem:[%s6836_s3 + $0x1c8] sm:$0xff] }
  0xc6   : > { %1454 = vmatpush.bf16.msra.mxu3 %v5423_v36 }
  0xc7   : > { %v922_v10 = vpack.c.bf16 %v890_v9, %v890_v9 }
  0xc8   : > { %v728_v13 = vpop.f32.mrf.mxu0 }
  0xc9   : > { %v817_v14 = vpop.f32.mrf.mxu1  ;;  %v987_v17 = vunpack.c.l.b16 %v922_v10  ;;  %v729_v18 = vadd.f32 %v5881_v23, %v728_v13  ;;  %v5433_v10 = vld [vmem:[%s6836_s3 + $0x1b8] sm:$0xff] }
  0xca   : > { %1455 = vmatpush.bf16.msra.mxu3 %v5422_v45 }
  0xcb   : > { %767 = vmatmul.bf16.gmra.mxu0 %v3794_v11  ;;  %v988_v20 = vpack.c.b16 %v987_v17, %v986_v16  ;;  %v818_v22 = vadd.f32 %v817_v14, %v729_v18  ;;  %v5418_v11 = vld [vmem:[%s6836_s3 + $0x140] sm:$0xff]  ;;  %v5432_v16 = vld [vmem:[%s6836_s3 + $0x1b0] sm:$0xff]  ;;  %v5441_v17 = vld [vmem:[%s6836_s3 + $0x1f8] sm:$0xff] }
  0xcc   : > { %856 = vmatmul.bf16.gmra.mxu1 %v3798_v12 }
  0xcd   : > { %1046 = vmatmul.bf16.vlgmr.msra.gmra.mxu2 %v988_v20  ;;  %v891_v28 = vmax.f32 %v818_v22, 0.0  ;;  %v5440_v22 = vld [vmem:[%s6836_s3 + $0x1f0] sm:$0xff] }
  0xce   : > { %1365 = vmatpush.bf16.msra.mxu2 %v5417_v19  ;;  %1456 = vmatpush.bf16.msra.mxu3 %v5421_v51  ;;  %v5427_v51 = vld [vmem:[%s6836_s3 + $0x188] sm:$0xff] }
  0xcf   : > { %v923_v37 = vpack.c.bf16 %v891_v28, %v891_v28  ;;  %v5357_v28 = vld [vmem:[%s5777_s14 + $0xd4] sm:$0xf0] }
  0xd0   : > { %v730_v25 = vpop.f32.mrf.mxu0  ;;  %v3818_v36 = vor.u32 %v5357_v28, %v3817_v27  ;;  %v5455_v27 = vld [vmem:[%s6836_s3 + $0x268] sm:$0xff] }
  0xd1   : > { %v819_v26 = vpop.f32.mrf.mxu1  ;;  %v731_v29 = vadd.f32 %v5881_v23, %v730_v25  ;;  %v1139_v46 = vunpack.c.l.b16 %v923_v37 }
  0xd2   : > { %1366 = vmatpush.bf16.msra.mxu2 %v5416_v24  ;;  %1457 = vmatpush.bf16.msra.mxu3 %v5420_v56  ;;  %v3825_v56 = vld [vmem:[%s5777_s14 + $0xe0] sm:$0xf] }
  0xd3   : > { %v820_v31 = vadd.f32 %v819_v26, %v731_v29  ;;  %v5356_v29 = vld [vmem:[%s5777_s14 + $0xd4] sm:$0xf] }
  0xd5   : > { %v892_v38 = vmax.f32 %v820_v31, 0.0  ;;  %v5430_v31 = vld [vmem:[%s6836_s3 + $0x1a0] sm:$0xff] }
  0xd6   : > { %1367 = vmatpush.bf16.msra.mxu2 %v5415_v30  ;;  %1458 = vmatpush.bf16.msra.mxu3 %v5419_v1  ;;  %v3819_v30 = vld [vmem:[%s5777_s14 + $0xd8] sm:$0xf0] }
  0xd7   : > { %v924_v40 = vpack.c.bf16 %v892_v38, %v892_v38  ;;  %v3822_v37 = vor.u32 %v5356_v29, %v3819_v30  ;;  %v5445_v30 = vld [vmem:[%s6836_s3 + $0x218] sm:$0xff] }
  0xd8   : > { %v733_v43 = vpop.f32.mrf.mxu0 }
  0xd9   : > { %v822_v44 = vpop.f32.mrf.mxu1  ;;  %v1140_v47 = vunpack.c.l.b16 %v924_v40  ;;  %v734_v48 = vadd.f32 %v5881_v23, %v733_v43  ;;  %v5429_v40 = vld [vmem:[%s6836_s3 + $0x198] sm:$0xff] }
  0xda   : > { %1368 = vmatpush.bf16.msra.mxu2 %v5414_v39  ;;  %1459 = vmatpush.bf16.msra.mxu3 %v5418_v11 }
  0xdb   : > { %772 = vmatmul.bf16.gmra.mxu0 %v3802_v41  ;;  %v1141_v50 = vpack.c.b16 %v1140_v47, %v1139_v46  ;;  %v823_v52 = vadd.f32 %v822_v44, %v734_v48  ;;  %v5438_v41 = vld [vmem:[%s6836_s3 + $0x1e0] sm:$0xff]  ;;  %v5428_v46 = vld [vmem:[%s6836_s3 + $0x190] sm:$0xff]  ;;  %v5437_v47 = vld [vmem:[%s6836_s3 + $0x1d8] sm:$0xff] }
  0xdc   : > { %861 = vmatmul.bf16.gmra.mxu1 %v3806_v42 }
  0xdd   : > { %1199 = vmatmul.bf16.vlgmr.msrb.gmra.mxu2 %v1141_v50  ;;  %v893_v57 = vmax.f32 %v823_v52, 0.0  ;;  %v5436_v52 = vld [vmem:[%s6836_s3 + $0x1d0] sm:$0xff] }
  0xde   : > { %1369 = vmatpush.bf16.msra.mxu2 %v5413_v49 }
  0xdf   : > { %v925_v2 = vpack.c.bf16 %v893_v57, %v893_v57  ;;  %v5359_v57 = vld [vmem:[%s5777_s14 + $0xe4] sm:$0xf0] }
  0xe0   : > { %v735_v54 = vpop.f32.mrf.mxu0 }
  0xe1   : > { %v824_v55 = vpop.f32.mrf.mxu1  ;;  %v736_v58 = vadd.f32 %v5881_v23, %v735_v54  ;;  %v1226_v12 = vunpack.c.l.b16 %v925_v2  ;;  %v3826_v2 = vor.u32 %v5359_v57, %v3825_v56  ;;  %v5451_v56 = vld [vmem:[%s6836_s3 + $0x248] sm:$0xff] }
  0xe2   : > { %1370 = vmatpush.bf16.msra.mxu2 %v5412_v53 }
  0xe3   : > { %v825_v60 = vadd.f32 %v824_v55, %v736_v58  ;;  %v5358_v58 = vld [vmem:[%s5777_s14 + $0xe4] sm:$0xf] }
  0xe5   : > { %v894_v3 = vmax.f32 %v825_v60, 0.0  ;;  %v5426_v60 = vld [vmem:[%s6836_s3 + $0x180] sm:$0xff] }
  0xe6   : > { %1371 = vmatpush.bf16.msra.mxu2 %v5411_v59  ;;  %v3827_v59 = vld [vmem:[%s5777_s14 + $0xe8] sm:$0xf0] }
  0xe7   : > { %v926_v5 = vpack.c.bf16 %v894_v3, %v894_v3  ;;  %v3830_v3 = vor.u32 %v5358_v58, %v3827_v59  ;;  %v5464_v58 = vld [vmem:[%s6836_s3 + $0x2b0] sm:$0xff] }
  0xe8   : > { %v738_v8 = vpop.f32.mrf.mxu0 }
  0xe9   : > { %v827_v9 = vpop.f32.mrf.mxu1  ;;  %v1227_v13 = vunpack.c.l.b16 %v926_v5  ;;  %v739_v14 = vadd.f32 %v5881_v23, %v738_v8 }
  0xea   : > { %1372 = vmatpush.bf16.msra.mxu2 %v5410_v4 }
  0xeb   : > { %777 = vmatmul.bf16.gmra.mxu0 %v3810_v6  ;;  %v1228_v15 = vpack.c.b16 %v1227_v13, %v1226_v12  ;;  %v828_v18 = vadd.f32 %v827_v9, %v739_v14  ;;  %v5434_v6 = vld [vmem:[%s6836_s3 + $0x1c0] sm:$0xff]  ;;  %v5457_v12 = vld [vmem:[%s6836_s3 + $0x278] sm:$0xff]  ;;  %v5447_v14 = vld [vmem:[%s6836_s3 + $0x228] sm:$0xff] }
  0xec   : > { %866 = vmatmul.bf16.gmra.mxu1 %v3814_v7 }
  0xed   : > { %1286 = vmatmul.bf16.vlgmr.msrb.gmra.mxu3 %v1228_v15  ;;  %v895_v24 = vmax.f32 %v828_v18, 0.0 }
  0xee   : > { %1539 = vmatpush.bf16.msrb.mxu2 %v5433_v10  ;;  %1626 = vmatpush.bf16.msrb.mxu3 %v5441_v17  ;;  %v5448_v10 = vld [vmem:[%s6836_s3 + $0x230] sm:$0xff] }
  0xef   : > { %v927_v33 = vpack.c.bf16 %v895_v24, %v895_v24  ;;  %v5456_v17 = vld [vmem:[%s6836_s3 + $0x270] sm:$0xff]  ;;  %v5361_v24 = vld [vmem:[%s5777_s14 + $0xf4] sm:$0xf0] }
  0xf0   : > { %v740_v19 = vpop.f32.mrf.mxu0 }
  0xf1   : > { %v829_v20 = vpop.f32.mrf.mxu1  ;;  %v741_v25 = vadd.f32 %v5881_v23, %v740_v19  ;;  %v1313_v42 = vunpack.c.l.b16 %v927_v33 }
  0xf2   : > { %1540 = vmatpush.bf16.msrb.mxu2 %v5432_v16  ;;  %1627 = vmatpush.bf16.msrb.mxu3 %v5440_v22  ;;  %v3833_v22 = vld [vmem:[%s5777_s14 + $0xf0] sm:$0xf] }
  0xf3   : > { %v830_v26 = vadd.f32 %v829_v20, %v741_v25  ;;  %v5446_v20 = vld [vmem:[%s6836_s3 + $0x220] sm:$0xff]  ;;  %v5360_v25 = vld [vmem:[%s5777_s14 + $0xf4] sm:$0xf] }
  0xf5   : > { %v896_v34 = vmax.f32 %v830_v26, 0.0  ;;  %v3835_v26 = vld [vmem:[%s5777_s14 + $0xf8] sm:$0xf0]  ;;  %s384_s14 = scalar_lea.vmem %s6844_s11, %s3710_s22 }
  0xf6   : > { %1541 = vmatpush.bf16.msrb.mxu2 %v5431_v21  ;;  %1628 = vmatpush.bf16.msrb.mxu3 %v5439_v32  ;;  %v3834_v32 = vor.u32 %v5361_v24, %v3833_v22  ;;  %v3838_v33 = vor.u32 %v5360_v25, %v3835_v26  ;;  %v5470_v25 = vld [vmem:[%s6836_s3 + $0x2e0] sm:$0xff] }
  0xf7   : > { %v928_v35 = vpack.c.bf16 %v896_v34, %v896_v34 }
  0xf8   : > { %v743_v38 = vpop.f32.mrf.mxu0 }
  0xf9   : > { %v832_v39 = vpop.f32.mrf.mxu1  ;;  %v1314_v43 = vunpack.c.l.b16 %v928_v35  ;;  %v744_v44 = vadd.f32 %v5881_v23, %v743_v38 }
  0xfa   : > { %1542 = vmatpush.bf16.msrb.mxu2 %v5430_v31  ;;  %1629 = vmatpush.bf16.msrb.mxu3 %v5438_v41 }
  0xfb   : > { %v1315_v45 = vpack.c.b16 %v1314_v43, %v1313_v42  ;;  %782 = vmatmul.bf16.gmra.mxu0 %v3818_v36  ;;  %v833_v48 = vadd.f32 %v832_v39, %v744_v44  ;;  %v5454_v36 = vld [vmem:[%s6836_s3 + $0x260] sm:$0xff]  ;;  %v5453_v42 = vld [vmem:[%s6836_s3 + $0x258] sm:$0xff]  ;;  %v5443_v44 = vld [vmem:[%s6836_s3 + $0x208] sm:$0xff] }
  0xfc   : > { %871 = vmatmul.bf16.gmra.mxu1 %v3822_v37 }
  0xfd   : > { %1373 = vmatmul.bf16.vlgmr.msra.gmra.mxu2 %v1315_v45  ;;  %v897_v53 = vmax.f32 %v833_v48, 0.0 }
  0xfe   : > { %1543 = vmatpush.bf16.msrb.mxu2 %v5429_v40  ;;  %1630 = vmatpush.bf16.msrb.mxu3 %v5437_v47  ;;  %v5444_v40 = vld [vmem:[%s6836_s3 + $0x210] sm:$0xff] }
  0xff   : > { %v929_v62 = vpack.c.bf16 %v897_v53, %v897_v53  ;;  %v5465_v53 = vld [vmem:[%s6836_s3 + $0x2b8] sm:$0xff] }
 0x100   : > { %v745_v49 = vpop.f32.mrf.mxu0 }
 0x101   : > { %v834_v50 = vpop.f32.mrf.mxu1  ;;  %v746_v54 = vadd.f32 %v5881_v23, %v745_v49  ;;  %v1400_v7 = vunpack.c.l.b16 %v929_v62  ;;  %v5521_v49 = vld [vmem:[%s6838_s5 + $0x78] sm:$0xff] }
 0x102   : > { %1544 = vmatpush.bf16.msrb.mxu2 %v5428_v46  ;;  %1631 = vmatpush.bf16.msrb.mxu3 %v5436_v52 }
 0x103   : > { %v835_v55 = vadd.f32 %v834_v50, %v746_v54  ;;  %v5452_v50 = vld [vmem:[%s6836_s3 + $0x250] sm:$0xff]  ;;  %2432 = vmatpush.bf16.msrb.mxu0 %v5521_v49 }
 0x105   : > { %v898_v63 = vmax.f32 %v835_v55, 0.0 }
 0x106   : > { %1545 = vmatpush.bf16.msrb.mxu2 %v5427_v51  ;;  %1632 = vmatpush.bf16.msrb.mxu3 %v5435_v61  ;;  %v5442_v51 = vld [vmem:[%s6836_s3 + $0x200] sm:$0xff] }
 0x107   : > { %v930_v1 = vpack.c.bf16 %v898_v63, %v898_v63 }
 0x108   : > { %v748_v4 = vpop.f32.mrf.mxu0 }
 0x109   : > { %v837_v5 = vpop.f32.mrf.mxu1  ;;  %v1401_v8 = vunpack.c.l.b16 %v930_v1  ;;  %v749_v9 = vadd.f32 %v5881_v23, %v748_v4 }
 0x10a   : > { %1546 = vmatpush.bf16.msrb.mxu2 %v5426_v60  ;;  %1633 = vmatpush.bf16.msrb.mxu3 %v5434_v6  ;;  %v5462_v6 = vld [vmem:[%s6836_s3 + $0x2a0] sm:$0xff] }
 0x10b   : > { %v1402_v11 = vpack.c.b16 %v1401_v8, %v1400_v7  ;;  %787 = vmatmul.bf16.gmra.mxu0 %v3826_v2  ;;  %v838_v13 = vadd.f32 %v837_v5, %v749_v9  ;;  %v5513_v2 = vld [vmem:[%s6838_s5 + $0x38] sm:$0xff] }
 0x10c   : > { %876 = vmatmul.bf16.gmra.mxu1 %v3830_v3  ;;  %v5463_v3 = vld [vmem:[%s6836_s3 + $0x2a8] sm:$0xff]  ;;  %v5473_v5 = vld [vmem:[%s6836_s3 + $0x2f8] sm:$0xff] }
 0x10d   : > { %1460 = vmatmul.bf16.vlgmr.msra.gmra.mxu3 %v1402_v11  ;;  %v899_v18 = vmax.f32 %v838_v13, 0.0  ;;  %2493 = vmatpush.bf16.msrb.mxu1 %v5513_v2  ;;  %v5472_v11 = vld [vmem:[%s6836_s3 + $0x2f0] sm:$0xff]  ;;  %v5461_v13 = vld [vmem:[%s6836_s3 + $0x298] sm:$0xff] }
 0x10e   : > { %1713 = vmatpush.bf16.msra.mxu2 %v5449_v0  ;;  %1800 = vmatpush.bf16.msra.mxu3 %v5457_v12  ;;  %v5450_v0 = vld [vmem:[%s6836_s3 + $0x240] sm:$0xff]  ;;  %v5476_v2 = vld [vmem:[%s6836_s3 + $0x310] sm:$0xff] }
 0x10f   : > { %v931_v28 = vpack.c.bf16 %v899_v18, %v899_v18  ;;  %v5460_v18 = vld [vmem:[%s6836_s3 + $0x290] sm:$0xff] }
 0x110   : > { %v750_v15 = vpop.f32.mrf.mxu0 }
 0x111   : > { %v839_v16 = vpop.f32.mrf.mxu1  ;;  %v751_v19 = vadd.f32 %v5881_v23, %v750_v15  ;;  %v1487_v37 = vunpack.c.l.b16 %v931_v28 }
 0x112   : > { %1714 = vmatpush.bf16.msra.mxu2 %v5448_v10  ;;  %1801 = vmatpush.bf16.msra.mxu3 %v5456_v17 }
 0x113   : > { %v840_v21 = vadd.f32 %v839_v16, %v751_v19  ;;  %v5471_v16 = vld [vmem:[%s6836_s3 + $0x2e8] sm:$0xff] }
 0x115   : > { %v900_v29 = vmax.f32 %v840_v21, 0.0 }
 0x116   : > { %1715 = vmatpush.bf16.msra.mxu2 %v5447_v14  ;;  %1802 = vmatpush.bf16.msra.mxu3 %v5455_v27  ;;  %v5459_v27 = vld [vmem:[%s6836_s3 + $0x288] sm:$0xff] }
 0x117   : > { %v932_v31 = vpack.c.bf16 %v900_v29, %v900_v29  ;;  %v5469_v29 = vld [vmem:[%s6836_s3 + $0x2d8] sm:$0xff] }
 0x118   : > { %v753_v34 = vpop.f32.mrf.mxu0 }
 0x119   : > { %v842_v35 = vpop.f32.mrf.mxu1  ;;  %v1488_v38 = vunpack.c.l.b16 %v932_v31  ;;  %v754_v39 = vadd.f32 %v5881_v23, %v753_v34 }
 0x11a   : > { %1716 = vmatpush.bf16.msra.mxu2 %v5446_v20  ;;  %1803 = vmatpush.bf16.msra.mxu3 %v5454_v36  ;;  %v5520_v36 = vld [vmem:[%s6838_s5 + $0x70] sm:$0xff] }
 0x11b   : > { %v1489_v41 = vpack.c.b16 %v1488_v38, %v1487_v37  ;;  %792 = vmatmul.bf16.gmra.mxu0 %v3834_v32  ;;  %v843_v43 = vadd.f32 %v842_v35, %v754_v39  ;;  %v5468_v37 = vld [vmem:[%s6836_s3 + $0x2d0] sm:$0xff] }
 0x11c   : > { %881 = vmatmul.bf16.gmra.mxu1 %v3838_v33  ;;  %v5481_v33 = vld [vmem:[%s6836_s3 + $0x338] sm:$0xff]  ;;  %2433 = vmatpush.bf16.msrb.mxu0 %v5520_v36  ;;  %v5480_v39 = vld [vmem:[%s6836_s3 + $0x330] sm:$0xff]  ;;  %v5495_v36 = vld [vmem:[%s6836_s3 + $0x3a8] sm:$0xff] }
 0x11d   : > { %1547 = vmatmul.bf16.vlgmr.msrb.gmra.mxu2 %v1489_v41  ;;  %v901_v47 = vmax.f32 %v843_v43, 0.0 }
 0x11e   : > { %1717 = vmatpush.bf16.msra.mxu2 %v5445_v30  ;;  %1804 = vmatpush.bf16.msra.mxu3 %v5453_v42  ;;  %v5458_v30 = vld [vmem:[%s6836_s3 + $0x280] sm:$0xff]  ;;  %v5467_v42 = vld [vmem:[%s6836_s3 + $0x2c8] sm:$0xff] }
 0x11f   : > { %v933_v54 = vpack.c.bf16 %v901_v47, %v901_v47 }
 0x120   : > { %v755_v45 = vpop.f32.mrf.mxu0 }
 0x121   : > { %v844_v46 = vpop.f32.mrf.mxu1  ;;  %v756_v48 = vadd.f32 %v5881_v23, %v755_v45  ;;  %v1574_v61 = vunpack.c.l.b16 %v933_v54 }
 0x122   : > { %1718 = vmatpush.bf16.msra.mxu2 %v5444_v40  ;;  %1805 = vmatpush.bf16.msra.mxu3 %v5452_v50  ;;  %v5466_v50 = vld [vmem:[%s6836_s3 + $0x2c0] sm:$0xff] }
 0x123   : > { %v845_v52 = vadd.f32 %v844_v46, %v756_v48  ;;  %v5479_v46 = vld [vmem:[%s6836_s3 + $0x328] sm:$0xff] }
 0x125   : > { %v902_v55 = vmax.f32 %v845_v52, 0.0  ;;  %v5512_v52 = vld [vmem:[%s6838_s5 + $0x30] sm:$0xff] }
 0x126   : > { %1719 = vmatpush.bf16.msra.mxu2 %v5443_v44  ;;  %1806 = vmatpush.bf16.msra.mxu3 %v5451_v56 }
 0x127   : > { %v934_v57 = vpack.c.bf16 %v902_v55, %v902_v55  ;;  %2494 = vmatpush.bf16.msrb.mxu1 %v5512_v52  ;;  %v5489_v55 = vld [vmem:[%s6836_s3 + $0x378] sm:$0xff] }
 0x128   : > { %v758_v59 = vpop.f32.mrf.mxu0 }
 0x129   : > { %v847_v60 = vpop.f32.mrf.mxu1  ;;  %v1575_v62 = vunpack.c.l.b16 %v934_v57  ;;  %v759_v63 = vadd.f32 %v5881_v23, %v758_v59  ;;  %v5477_v59 = vld [vmem:[%s6836_s3 + $0x318] sm:$0xff] }
 0x12a   : > { %1720 = vmatpush.bf16.msra.mxu2 %v5442_v51  ;;  %1807 = vmatpush.bf16.msra.mxu3 %v5450_v0 }
 0x12b   : > { %v1576_v1 = vpack.c.b16 %v1575_v62, %v1574_v61  ;;  %v848_v4 = vadd.f32 %v847_v60, %v759_v63  ;;  %v5488_v63 = vld [vmem:[%s6836_s3 + $0x370] sm:$0xff] }
 0x12d   : > { %1634 = vmatmul.bf16.vlgmr.msrb.gmra.mxu3 %v1576_v1  ;;  %v903_v9 = vmax.f32 %v848_v4, 0.0 }
 0x12e   : > { %1887 = vmatpush.bf16.msrb.mxu2 %v5465_v53  ;;  %1974 = vmatpush.bf16.msrb.mxu3 %v5473_v5  ;;  %v5478_v53 = vld [vmem:[%s6836_s3 + $0x320] sm:$0xff]  ;;  %v5487_v5 = vld [vmem:[%s6836_s3 + $0x368] sm:$0xff] }
 0x12f   : > { %v935_v14 = vpack.c.bf16 %v903_v9, %v903_v9  ;;  %v5475_v9 = vld [vmem:[%s6836_s3 + $0x308] sm:$0xff] }
 0x130   : > { %v760_v7 = vpop.f32.mrf.mxu0 }
 0x131   : > { %v849_v8 = vpop.f32.mrf.mxu1  ;;  %v761_v10 = vadd.f32 %v5881_v23, %v760_v7  ;;  %v1661_v21 = vunpack.c.l.b16 %v935_v14 }
 0x132   : > { %1888 = vmatpush.bf16.msrb.mxu2 %v5464_v58  ;;  %1975 = vmatpush.bf16.msrb.mxu3 %v5472_v11 }
 0x133   : > { %v850_v12 = vadd.f32 %v849_v8, %v761_v10 }
 0x135   : > { %v904_v15 = vmax.f32 %v850_v12, 0.0 }
 0x136   : > { %1889 = vmatpush.bf16.msrb.mxu2 %v5463_v3  ;;  %1976 = vmatpush.bf16.msrb.mxu3 %v5471_v16 }
 0x137   : > { %v936_v17 = vpack.c.bf16 %v904_v15, %v904_v15  ;;  %v5486_v15 = vld [vmem:[%s6836_s3 + $0x360] sm:$0xff] }
 0x138   : > { %v763_v19 = vpop.f32.mrf.mxu0 }
 0x139   : > { %v852_v20 = vpop.f32.mrf.mxu1  ;;  %v1662_v22 = vunpack.c.l.b16 %v936_v17  ;;  %v764_v24 = vadd.f32 %v5881_v23, %v763_v19 }
 0x13a   : > { %1890 = vmatpush.bf16.msrb.mxu2 %v5462_v6  ;;  %1977 = vmatpush.bf16.msrb.mxu3 %v5470_v25 }
 0x13b   : > { %v1663_v26 = vpack.c.b16 %v1662_v22, %v1661_v21  ;;  %v853_v28 = vadd.f32 %v852_v20, %v764_v24  ;;  %v5485_v20 = vld [vmem:[%s6836_s3 + $0x358] sm:$0xff] }
 0x13c   : > { %v5497_v21 = vld [vmem:[%s6836_s3 + $0x3b8] sm:$0xff] }
 0x13d   : > { %1721 = vmatmul.bf16.vlgmr.msra.gmra.mxu2 %v1663_v26  ;;  %v905_v34 = vmax.f32 %v853_v28, 0.0  ;;  %v5519_v28 = vld [vmem:[%s6838_s5 + $0x68] sm:$0xff] }
 0x13e   : > { %1891 = vmatpush.bf16.msrb.mxu2 %v5461_v13  ;;  %1978 = vmatpush.bf16.msrb.mxu3 %v5469_v29  ;;  %v5484_v29 = vld [vmem:[%s6836_s3 + $0x350] sm:$0xff] }
 0x13f   : > { %v937_v40 = vpack.c.bf16 %v905_v34, %v905_v34  ;;  %2434 = vmatpush.bf16.msrb.mxu0 %v5519_v28 }
 0x140   : > { %v765_v31 = vpop.f32.mrf.mxu0  ;;  %v1115_v56 = vpop.f32.mrf.mxu3 }
 0x141   : > { %v854_v32 = vpop.f32.mrf.mxu1  ;;  %v766_v35 = vadd.f32 %v5881_v23, %v765_v31  ;;  %v1748_v47 = vunpack.c.l.b16 %v937_v40 }
 0x142   : > { %1892 = vmatpush.bf16.msrb.mxu2 %v5460_v18  ;;  %1979 = vmatpush.bf16.msrb.mxu3 %v5468_v37  ;;  %v5474_v18 = vld [vmem:[%s6836_s3 + $0x300] sm:$0xff] }
 0x143   : > { %v855_v38 = vadd.f32 %v854_v32, %v766_v35  ;;  %v5483_v35 = vld [vmem:[%s6836_s3 + $0x348] sm:$0xff] }
 0x145   : > { %v906_v41 = vmax.f32 %v855_v38, 0.0 }
 0x146   : > { %1893 = vmatpush.bf16.msrb.mxu2 %v5459_v27  ;;  %1980 = vmatpush.bf16.msrb.mxu3 %v5467_v42 }
 0x147   : > { %v938_v43 = vpack.c.bf16 %v906_v41, %v906_v41 }
 0x148   : > { %v768_v44 = vpop.f32.mrf.mxu0  ;;  %v1117_v11 = vpop.f32.mrf.mxu3 }
 0x149   : > { %v857_v45 = vpop.f32.mrf.mxu1  ;;  %v1749_v48 = vunpack.c.l.b16 %v938_v43  ;;  %v769_v49 = vadd.f32 %v5881_v23, %v768_v44  ;;  %v5482_v44 = vld [vmem:[%s6836_s3 + $0x340] sm:$0xff] }
 0x14a   : > { %1894 = vmatpush.bf16.msrb.mxu2 %v5458_v30  ;;  %1981 = vmatpush.bf16.msrb.mxu3 %v5466_v50  ;;  %v5496_v30 = vld [vmem:[%s6836_s3 + $0x3b0] sm:$0xff]  ;;  %v5505_v50 = vld [vmem:[%s6836_s3 + $0x3f8] sm:$0xff] }
 0x14b   : > { %v1750_v51 = vpack.c.b16 %v1749_v48, %v1748_v47  ;;  %v858_v54 = vadd.f32 %v857_v45, %v769_v49  ;;  %v5511_v48 = vld [vmem:[%s6838_s5 + $0x28] sm:$0xff] }
 0x14c   : > { %2495 = vmatpush.bf16.msrb.mxu1 %v5511_v48 }
 0x14d   : > { %1808 = vmatmul.bf16.vlgmr.msra.gmra.mxu3 %v1750_v51  ;;  %v907_v60 = vmax.f32 %v858_v54, 0.0  ;;  %v5493_v51 = vld [vmem:[%s6836_s3 + $0x398] sm:$0xff] }
 0x14e   : > { %2061 = vmatpush.bf16.msra.mxu2 %v5481_v33  ;;  %2148 = vmatpush.bf16.msra.mxu3 %v5489_v55 }
 0x14f   : > { %v939_v3 = vpack.c.bf16 %v907_v60, %v907_v60 }
 0x150   : > { %v770_v57 = vpop.f32.mrf.mxu0  ;;  %v1047_v62 = vpop.f32.mrf.mxu2 }
 0x151   : > { %v859_v58 = vpop.f32.mrf.mxu1  ;;  %v771_v61 = vadd.f32 %v5881_v23, %v770_v57  ;;  %v1116_v0 = vadd.f32 %v1115_v56, %v1047_v62  ;;  %v1835_v10 = vunpack.c.l.b16 %v939_v3  ;;  %v5504_v57 = vld [vmem:[%s6836_s3 + $0x3f0] sm:$0xff] }
 0x152   : > { %2062 = vmatpush.bf16.msra.mxu2 %v5480_v39  ;;  %2149 = vmatpush.bf16.msra.mxu3 %v5488_v63  ;;  %v5503_v63 = vld [vmem:[%s6836_s3 + $0x3e8] sm:$0xff] }
 0x153   : > { %v860_v1 = vadd.f32 %v859_v58, %v771_v61 }
 0x155   : > { %v908_v4 = vmax.f32 %v860_v1, 0.0 }
 0x156   : > { %2063 = vmatpush.bf16.msra.mxu2 %v5479_v46  ;;  %2150 = vmatpush.bf16.msra.mxu3 %v5487_v5  ;;  %v5494_v46 = vld [vmem:[%s6836_s3 + $0x3a0] sm:$0xff] }
 0x157   : > { %v940_v6 = vpack.c.bf16 %v908_v4, %v908_v4 }
 0x158   : > { %v773_v7 = vpop.f32.mrf.mxu0  ;;  %v1049_v14 = vpop.f32.mrf.mxu2 }
 0x159   : > { %v862_v8 = vpop.f32.mrf.mxu1  ;;  %v1836_v12 = vunpack.c.l.b16 %v940_v6  ;;  %v774_v13 = vadd.f32 %v5881_v23, %v773_v7  ;;  %v1118_v16 = vadd.f32 %v1117_v11, %v1049_v14 }
 0x15a   : > { %2064 = vmatpush.bf16.msra.mxu2 %v5478_v53  ;;  %2151 = vmatpush.bf16.msra.mxu3 %v5486_v15 }
 0x15b   : > { %v1837_v17 = vpack.c.b16 %v1836_v12, %v1835_v10  ;;  %v863_v19 = vadd.f32 %v862_v8, %v774_v13  ;;  %v5502_v8 = vld [vmem:[%s6836_s3 + $0x3e0] sm:$0xff]  ;;  %v5501_v13 = vld [vmem:[%s6836_s3 + $0x3d8] sm:$0xff] }
 0x15c   : > { %v5490_v10 = vld [vmem:[%s6836_s3 + $0x380] sm:$0xff] }
 0x15d   : > { %1895 = vmatmul.bf16.vlgmr.msrb.gmra.mxu2 %v1837_v17  ;;  %v909_v25 = vmax.f32 %v863_v19, 0.0  ;;  %v5518_v19 = vld [vmem:[%s6838_s5 + $0x60] sm:$0xff] }
 0x15e   : > { %2065 = vmatpush.bf16.msra.mxu2 %v5477_v59  ;;  %2152 = vmatpush.bf16.msra.mxu3 %v5485_v20  ;;  %v5492_v59 = vld [vmem:[%s6836_s3 + $0x390] sm:$0xff] }
 0x15f   : > { %v941_v33 = vpack.c.bf16 %v909_v25, %v909_v25  ;;  %v5500_v20 = vld [vmem:[%s6836_s3 + $0x3d0] sm:$0xff]  ;;  %2435 = vmatpush.bf16.msrb.mxu0 %v5518_v19  ;;  %v5499_v25 = vld [vmem:[%s6836_s3 + $0x3c8] sm:$0xff] }
 0x160   : > { %v775_v22 = vpop.f32.mrf.mxu0  ;;  %v1200_v27 = vpop.f32.mrf.mxu2  ;;  %v5536_v19 = vld [vmem:[%s6838_s5 + $0xf0] sm:$0xff] }
 0x161   : > { %v864_v24 = vpop.f32.mrf.mxu1  ;;  %v776_v26 = vadd.f32 %v5881_v23, %v775_v22  ;;  %v1205_v31 = vadd.f32 %v1200_v27, %v1116_v0  ;;  %v1922_v40 = vunpack.c.l.b16 %v941_v33  ;;  %v5491_v0 = vld [vmem:[%s6836_s3 + $0x388] sm:$0xff]  ;;  %v5498_v33 = vld [vmem:[%s6836_s3 + $0x3c0] sm:$0xff] }
 0x162   : > { %2066 = vmatpush.bf16.msra.mxu2 %v5476_v2  ;;  %2153 = vmatpush.bf16.msra.mxu3 %v5484_v29 }
 0x163   : > { %v865_v32 = vadd.f32 %v864_v24, %v776_v26 }
 0x165   : > { %v910_v34 = vmax.f32 %v865_v32, 0.0 }
 0x166   : > { %2067 = vmatpush.bf16.msra.mxu2 %v5475_v9  ;;  %2154 = vmatpush.bf16.msra.mxu3 %v5483_v35 }
 0x167   : > { %v942_v37 = vpack.c.bf16 %v910_v34, %v910_v34 }
 0x168   : > { %v778_v38 = vpop.f32.mrf.mxu0  ;;  %v1202_v43 = vpop.f32.mrf.mxu2 }
 0x169   : > { %v867_v39 = vpop.f32.mrf.mxu1  ;;  %v1923_v41 = vunpack.c.l.b16 %v942_v37  ;;  %v779_v42 = vadd.f32 %v5881_v23, %v778_v38  ;;  %v1206_v45 = vadd.f32 %v1202_v43, %v1118_v16  ;;  %v5652_v16 = vld [vmem:[%s6835_s2] ss:$0 sm:$0xff] }
 0x16a   : > { %2068 = vmatpush.bf16.msra.mxu2 %v5474_v18  ;;  %2155 = vmatpush.bf16.msra.mxu3 %v5482_v44 }
 0x16b   : > { %v1924_v47 = vpack.c.b16 %v1923_v41, %v1922_v40  ;;  %v868_v49 = vadd.f32 %v867_v39, %v779_v42 }
 0x16d   : > { %1982 = vmatmul.bf16.vlgmr.msrb.gmra.mxu3 %v1924_v47  ;;  %v911_v54 = vmax.f32 %v868_v49, 0.0 }
 0x16e   : > { %2235 = vmatpush.bf16.msrb.mxu2 %v5497_v21  ;;  %2322 = vmatpush.bf16.msrb.mxu3 %v5505_v50 }
 0x16f   : > { %v943_v61 = vpack.c.bf16 %v911_v54, %v911_v54 }
 0x170   : > { %v780_v52 = vpop.f32.mrf.mxu0  ;;  %v1287_v56 = vpop.f32.mrf.mxu3 }
 0x171   : > { %v869_v53 = vpop.f32.mrf.mxu1  ;;  %v781_v55 = vadd.f32 %v5881_v23, %v780_v52  ;;  %v6255_v58 = vadd.f32 %v1287_v56, %v1205_v31  ;;  %v2009_v4 = vunpack.c.l.b16 %v943_v61 }
 0x172   : > { %2236 = vmatpush.bf16.msrb.mxu2 %v5496_v30  ;;  %2323 = vmatpush.bf16.msrb.mxu3 %v5504_v57 }
 0x173   : > { %v870_v60 = vadd.f32 %v869_v53, %v781_v55  ;;  %v5517_v53 = vld [vmem:[%s6838_s5 + $0x58] sm:$0xff] }
 0x174   : > { %2436 = vmatpush.bf16.msrb.mxu0 %v5517_v53  ;;  %v5568_v53 = vld [vmem:[%s6838_s5 + $0x1f0] sm:$0xff] }
 0x175   : > { %v912_v62 = vmax.f32 %v870_v60, 0.0 }
 0x176   : > { %2237 = vmatpush.bf16.msrb.mxu2 %v5495_v36  ;;  %2324 = vmatpush.bf16.msrb.mxu3 %v5503_v63  ;;  %v5510_v36 = vld [vmem:[%s6838_s5 + $0x20] sm:$0xff] }
 0x177   : > { %v944_v1 = vpack.c.bf16 %v912_v62, %v912_v62  ;;  %2496 = vmatpush.bf16.msrb.mxu1 %v5510_v36  ;;  %v5509_v62 = vld [vmem:[%s6838_s5 + $0x18] sm:$0xff]  ;;  %v5523_v36 = vld [vmem:[%s6838_s5 + $0x88] sm:$0xff] }
 0x178   : > { %v783_v2 = vpop.f32.mrf.mxu0  ;;  %v1289_v7 = vpop.f32.mrf.mxu3 }
 0x179   : > { %v872_v3 = vpop.f32.mrf.mxu1  ;;  %v2010_v5 = vunpack.c.l.b16 %v944_v1  ;;  %v784_v6 = vadd.f32 %v5881_v23, %v783_v2  ;;  %v1293_v9 = vadd.f32 %v1289_v7, %v1206_v45 }
 0x17a   : > { %2238 = vmatpush.bf16.msrb.mxu2 %v5494_v46  ;;  %2325 = vmatpush.bf16.msrb.mxu3 %v5502_v8 }
 0x17b   : > { %v2011_v11 = vpack.c.b16 %v2010_v5, %v2009_v4  ;;  %v873_v12 = vadd.f32 %v872_v3, %v784_v6  ;;  %2497 = vmatpush.bf16.msrb.mxu1 %v5509_v62  ;;  %v5539_v62 = vld [vmem:[%s6838_s5 + $0x108] sm:$0xff] }
 0x17d   : > { %2069 = vmatmul.bf16.vlgmr.msra.gmra.mxu2 %v2011_v11  ;;  %v913_v15 = vmax.f32 %v873_v12, 0.0  ;;  %v5516_v12 = vld [vmem:[%s6838_s5 + $0x50] sm:$0xff] }
 0x17e   : > { %2239 = vmatpush.bf16.msrb.mxu2 %v5493_v51  ;;  %2326 = vmatpush.bf16.msrb.mxu3 %v5501_v13  ;;  %v5508_v13 = vld [vmem:[%s6838_s5 + $0x10] sm:$0xff] }
 0x17f   : > { %v945_v22 = vpack.c.bf16 %v913_v15, %v913_v15  ;;  %2437 = vmatpush.bf16.msrb.mxu0 %v5516_v12  ;;  %2498 = vmatpush.bf16.msrb.mxu1 %v5508_v13  ;;  %v5529_v15 = vld [vmem:[%s6838_s5 + $0xb8] sm:$0xff]  ;;  %v5564_v12 = vld [vmem:[%s6838_s5 + $0x1d0] sm:$0xff] }
 0x180   : > { %v785_v23 = vpop.f32.mrf.mxu0  ;;  %v6279_v18 = vpop.f32.mrf.mxu2 }
 0x181   : > { %v874_v14 = vpop.f32.mrf.mxu1  ;;  %v786_v17 = vadd.f32 %v5652_v16, %v785_v23  ;;  %v2096_v29 = vunpack.c.l.b16 %v945_v22  ;;  %v5515_v23 = vld [vmem:[%s6838_s5 + $0x48] sm:$0xff] }
 0x182   : > { %2240 = vmatpush.bf16.msrb.mxu2 %v5492_v59  ;;  %2327 = vmatpush.bf16.msrb.mxu3 %v5500_v20  ;;  %v5527_v20 = vld [vmem:[%s6838_s5 + $0xa8] sm:$0xff] }
 0x183   : > { %v875_v21 = vadd.f32 %v874_v14, %v786_v17  ;;  %2438 = vmatpush.bf16.msrb.mxu0 %v5515_v23  ;;  %v5507_v14 = vld [vmem:[%s6838_s5 + $0x8] sm:$0xff]  ;;  %v5528_v17 = vld [vmem:[%s6838_s5 + $0xb0] sm:$0xff] }
 0x184   : > { %2499 = vmatpush.bf16.msrb.mxu1 %v5507_v14  ;;  %v5535_v22 = vld [vmem:[%s6838_s5 + $0xe8] sm:$0xff] }
 0x185   : > { %v914_v24 = vmax.f32 %v875_v21, 0.0 }
 0x186   : > { %2241 = vmatpush.bf16.msrb.mxu2 %v5491_v0  ;;  %2328 = vmatpush.bf16.msrb.mxu3 %v5499_v25  ;;  %v5526_v25 = vld [vmem:[%s6838_s5 + $0xa0] sm:$0xff] }
 0x187   : > { %v946_v26 = vpack.c.bf16 %v914_v24, %v914_v24  ;;  %v5514_v24 = vld [vmem:[%s6838_s5 + $0x40] sm:$0xff] }
 0x188   : > { %v788_v27 = vpop.f32.mrf.mxu0  ;;  %v1376_v32 = vpop.f32.mrf.mxu2  ;;  %2439 = vmatpush.bf16.msrb.mxu0 %v5514_v24 }
 0x189   : > { %v877_v28 = vpop.f32.mrf.mxu1  ;;  %v2097_v30 = vunpack.c.l.b16 %v946_v26  ;;  %v789_v31 = vadd.f32 %v5652_v16, %v788_v27  ;;  %v1380_v34 = vadd.f32 %v1376_v32, %v1293_v9  ;;  %v5534_v27 = vld [vmem:[%s6838_s5 + $0xe0] sm:$0xff]  ;;  %v5524_v32 = vld [vmem:[%s6838_s5 + $0x90] sm:$0xff] }
 0x18a   : > { %2242 = vmatpush.bf16.msrb.mxu2 %v5490_v10  ;;  %2329 = vmatpush.bf16.msrb.mxu3 %v5498_v33  ;;  %v5544_v33 = vld [vmem:[%s6838_s5 + $0x130] sm:$0xff] }
 0x18b   : > { %v2098_v35 = vpack.c.b16 %v2097_v30, %v2096_v29  ;;  %v878_v37 = vadd.f32 %v877_v28, %v789_v31  ;;  %v5545_v28 = vld [vmem:[%s6838_s5 + $0x138] sm:$0xff] }
 0x18c   : > { %v5525_v29 = vld [vmem:[%s6838_s5 + $0x98] sm:$0xff]  ;;  %2736 = vmatpush.bf16.msra.mxu0 %v5545_v28  ;;  %v5651_v28 = vld [vmem:[%s6837_s4] ss:$0 sm:$0xff] }
 0x18d   : > { %2156 = vmatmul.bf16.vlgmr.msra.gmra.mxu3 %v2098_v35  ;;  %v915_v40 = vmax.f32 %v878_v37, 0.0  ;;  %v5533_v31 = vld [vmem:[%s6838_s5 + $0xd8] sm:$0xff]  ;;  %v5532_v35 = vld [vmem:[%s6838_s5 + $0xd0] sm:$0xff]  ;;  %v5543_v37 = vld [vmem:[%s6838_s5 + $0x128] sm:$0xff] }
 0x18e   : > { %2574 = vmatpush.bf16.msra.mxu2 %v5529_v15  ;;  %v5546_v15 = vld [vmem:[%s6838_s5 + $0x140] sm:$0xff] }
 0x18f   : > { %v947_v44 = vpack.c.bf16 %v915_v40, %v915_v40  ;;  %v5531_v40 = vld [vmem:[%s6838_s5 + $0xc8] sm:$0xff] }
 0x190   : > { %v790_v38 = vpop.f32.mrf.mxu0  ;;  %v6296_v42 = vpop.f32.mrf.mxu3  ;;  %2737 = vmatpush.bf16.msra.mxu0 %v5544_v33 }
 0x191   : > { %v879_v39 = vpop.f32.mrf.mxu1  ;;  %v791_v41 = vadd.f32 %v5652_v16, %v790_v38  ;;  %v2183_v49 = vunpack.c.l.b16 %v947_v44  ;;  %v5542_v44 = vld [vmem:[%s6838_s5 + $0x120] sm:$0xff] }
 0x192   : > { %2575 = vmatpush.bf16.msra.mxu2 %v5528_v17  ;;  %v5554_v17 = vld [vmem:[%s6838_s5 + $0x180] sm:$0xff] }
 0x193   : > { %v880_v43 = vadd.f32 %v879_v39, %v791_v41  ;;  %v5553_v41 = vld [vmem:[%s6838_s5 + $0x178] sm:$0xff] }
 0x194   : > { %2738 = vmatpush.bf16.msra.mxu0 %v5543_v37 }
 0x195   : > { %v916_v45 = vmax.f32 %v880_v43, 0.0  ;;  %v5522_v43 = vld [vmem:[%s6838_s5 + $0x80] sm:$0xff] }
 0x196   : > { %2576 = vmatpush.bf16.msra.mxu2 %v5527_v20 }
 0x197   : > { %v948_v46 = vpack.c.bf16 %v916_v45, %v916_v45  ;;  %v5561_v45 = vld [vmem:[%s6838_s5 + $0x1b8] sm:$0xff] }
 0x198   : > { %v793_v47 = vpop.f32.mrf.mxu0  ;;  %v1463_v52 = vpop.f32.mrf.mxu3  ;;  %2739 = vmatpush.bf16.msra.mxu0 %v5542_v44 }
 0x199   : > { %v882_v48 = vpop.f32.mrf.mxu1  ;;  %v2184_v50 = vunpack.c.l.b16 %v948_v46  ;;  %v794_v51 = vadd.f32 %v5652_v16, %v793_v47  ;;  %v1467_v54 = vadd.f32 %v1463_v52, %v1380_v34  ;;  %v5506_v34 = vld [vmem:[%s6838_s5] sm:$0xff]  ;;  %v5552_v47 = vld [vmem:[%s6838_s5 + $0x170] sm:$0xff]  ;;  %v5551_v52 = vld [vmem:[%s6838_s5 + $0x168] sm:$0xff] }
 0x19a   : > { %2577 = vmatpush.bf16.msra.mxu2 %v5526_v25  ;;  %2500 = vmatpush.bf16.msrb.mxu1 %v5506_v34  ;;  %v5530_v46 = vld [vmem:[%s6838_s5 + $0xc0] sm:$0xff] }
 0x19b   : > { %v2185_v55 = vpack.c.b16 %v2184_v50, %v2183_v49  ;;  %v883_v56 = vadd.f32 %v882_v48, %v794_v51  ;;  %v5569_v48 = vld [vmem:[%s6838_s5 + $0x1f8] sm:$0xff]  ;;  %v5560_v51 = vld [vmem:[%s6838_s5 + $0x1b0] sm:$0xff] }
 0x19c   : > { %v5541_v50 = vld [vmem:[%s6838_s5 + $0x118] sm:$0xff] }
 0x19d   : > { %2243 = vmatmul.bf16.vlgmr.msrb.gmra.mxu2 %v2185_v55  ;;  %v917_v59 = vmax.f32 %v883_v56, 0.0  ;;  %2740 = vmatpush.bf16.msra.mxu0 %v5541_v50  ;;  %v5540_v55 = vld [vmem:[%s6838_s5 + $0x110] sm:$0xff]  ;;  %v5559_v56 = vld [vmem:[%s6838_s5 + $0x1a8] sm:$0xff] }
 0x19e   : > { %2578 = vmatpush.bf16.msra.mxu2 %v5525_v29  ;;  %2817 = vmatpush.bf16.msra.mxu1 %v5553_v41 }
 0x19f   : > { %v949_v1 = vpack.c.bf16 %v917_v59, %v917_v59  ;;  %v5567_v59 = vld [vmem:[%s6838_s5 + $0x1e8] sm:$0xff] }
 0x1a0   : > { %v795_v57 = vpop.f32.mrf.mxu0  ;;  %v6301_v61 = vpop.f32.mrf.mxu2 }
 0x1a1   : > { %v796_v60 = vadd.f32 %v5652_v16, %v795_v57  ;;  %v884_v63 = vpop.f32.mrf.mxu1  ;;  %v2270_v4 = vunpack.c.l.b16 %v949_v1  ;;  %v5537_v16 = vld [vmem:[%s6838_s5 + $0xf8] sm:$0xff]  ;;  %2741 = vmatpush.bf16.msra.mxu0 %v5540_v55  ;;  %v5550_v57 = vld [vmem:[%s6838_s5 + $0x160] sm:$0xff]  ;;  %v5572_v55 = vld [vmem:[%s6838_s5 + $0x210] sm:$0xff] }
 0x1a2   : > { %2655 = vmatpush.bf16.msra.mxu3 %v5537_v16  ;;  %2579 = vmatpush.bf16.msra.mxu2 %v5524_v32  ;;  %v5566_v1 = vld [vmem:[%s6838_s5 + $0x1e0] sm:$0xff]  ;;  %v5563_v16 = vld [vmem:[%s6838_s5 + $0x1c8] sm:$0xff] }
 0x1a3   : > { %v885_v0 = vadd.f32 %v884_v63, %v796_v60  ;;  %2818 = vmatpush.bf16.msra.mxu1 %v5552_v47  ;;  %v5558_v63 = vld [vmem:[%s6838_s5 + $0x1a0] sm:$0xff] }
 0x1a5   : > { %v918_v2 = vmax.f32 %v885_v0, 0.0  ;;  %2742 = vmatpush.bf16.msra.mxu0 %v5539_v62  ;;  %v5549_v0 = vld [vmem:[%s6838_s5 + $0x158] sm:$0xff] }
 0x1a6   : > { %2656 = vmatpush.bf16.msra.mxu3 %v5536_v19  ;;  %2580 = vmatpush.bf16.msra.mxu2 %v5523_v36 }
 0x1a7   : > { %v950_v3 = vpack.c.bf16 %v918_v2, %v918_v2  ;;  %2819 = vmatpush.bf16.msra.mxu1 %v5551_v52 }
 0x1a8   : > { %v1550_v6 = vpop.f32.mrf.mxu2 }
 0x1a9   : > { %v2271_v5 = vunpack.c.l.b16 %v950_v3  ;;  %v1554_v7 = vadd.f32 %v1550_v6, %v1467_v54  ;;  %v5538_v3 = vld [vmem:[%s6838_s5 + $0x100] sm:$0xff] }
 0x1aa   : > { %2657 = vmatpush.bf16.msra.mxu3 %v5535_v22  ;;  %2581 = vmatpush.bf16.msra.mxu2 %v5522_v43  ;;  %v5562_v22 = vld [vmem:[%s6838_s5 + $0x1c0] sm:$0xff]  ;;  %v5575_v43 = vld [vmem:[%s6838_s5 + $0x228] sm:$0xff] }
 0x1ab   : > { %v2272_v8 = vpack.c.b16 %v2271_v5, %v2270_v4  ;;  %2820 = vmatpush.bf16.msra.mxu1 %v5550_v57  ;;  %v1379_v4 = vadd.f32 %v6279_v18, %v6255_v58  ;;  %v5557_v5 = vld [vmem:[%s6838_s5 + $0x198] sm:$0xff]  ;;  %2743 = vmatpush.bf16.msra.mxu0 %v5538_v3  ;;  %v5556_v18 = vld [vmem:[%s6838_s5 + $0x190] sm:$0xff]  ;;  %v5571_v57 = vld [vmem:[%s6838_s5 + $0x208] sm:$0xff] }
 0x1ad   : > { %2330 = vmatmul.bf16.vlgmr.msrb.gmra.mxu3 %v2272_v8  ;;  %v1466_v6 = vadd.f32 %v6296_v42, %v1379_v4  ;;  %v5565_v8 = vld [vmem:[%s6838_s5 + $0x1d8] sm:$0xff]  ;;  %v5547_v42 = vld [vmem:[%s6838_s5 + $0x148] sm:$0xff]  ;;  %v5187_v4 = vld [vmem:[%s6840_s7 + $0xf0] sm:$0xf0] }
 0x1ae   : > { %2658 = vmatpush.bf16.msra.mxu3 %v5534_v27  ;;  %2898 = vmatpush.bf16.msrb.mxu2 %v5561_v45 }
 0x1af   : > { %2821 = vmatpush.bf16.msra.mxu1 %v5549_v0  ;;  %v1553_v58 = vadd.f32 %v6301_v61, %v1466_v6  ;;  %v5555_v61 = vld [vmem:[%s6838_s5 + $0x188] sm:$0xff]  ;;  %v5185_v0 = vld [vmem:[%s6840_s7 + $0xe0] sm:$0xf]  ;;  %v5609_v6 = vld [vmem:[%s6840_s7 + $0xf4] sm:$0xf0] }
 0x1b0   : > { %v6306_v9 = vpop.f32.mrf.mxu3 }
 0x1b1   : > { %v1640_v13 = vadd.f32 %v6306_v9, %v1553_v58  ;;  %v5195_v58 = vld [vmem:[%s6840_s7 + $0xf8] sm:$0xf0] }
 0x1b2   : > { %2659 = vmatpush.bf16.msra.mxu3 %v5533_v31  ;;  %2899 = vmatpush.bf16.msrb.mxu2 %v5560_v51 }
 0x1b6   : > { %2660 = vmatpush.bf16.msra.mxu3 %v5532_v35  ;;  %2900 = vmatpush.bf16.msrb.mxu2 %v5559_v56  ;;  %v5577_v35 = vld [vmem:[%s6838_s5 + $0x238] sm:$0xff] }
 0x1b8   : > { %v1637_v10 = vpop.f32.mrf.mxu3 }
 0x1b9   : > { %v6308_v11 = vadd.f32 %v1637_v10, %v1554_v7  ;;  %v5548_v7 = vld [vmem:[%s6838_s5 + $0x150] sm:$0xff] }
 0x1ba   : > { %2661 = vmatpush.bf16.msra.mxu3 %v5531_v40  ;;  %2901 = vmatpush.bf16.msrb.mxu2 %v5558_v63  ;;  %v5576_v40 = vld [vmem:[%s6838_s5 + $0x230] sm:$0xff] }
 0x1bb   : > { %2822 = vmatpush.bf16.msra.mxu1 %v5548_v7 }
 0x1be   : > { %2662 = vmatpush.bf16.msra.mxu3 %v5530_v46  ;;  %2902 = vmatpush.bf16.msrb.mxu2 %v5557_v5  ;;  %v5574_v46 = vld [vmem:[%s6838_s5 + $0x220] sm:$0xff]  ;;  %v5193_v5 = vld [vmem:[%s6840_s7 + $0xe8] sm:$0xf] }
 0x1bf   : > { %2823 = vmatpush.bf16.msra.mxu1 %v5547_v42  ;;  %v5169_v42 = vld [vmem:[%s6840_s7 + $0xc0] sm:$0xf] }
 0x1c0   : > { %v6337_v21 = vpop.f32.mrf.mxu2 }
 0x1c1   : > { %v1727_v23 = vadd.f32 %v6337_v21, %v1640_v13  ;;  %v5602_v13 = vld [vmem:[%s6840_s7 + $0xc4] sm:$0xf] }
 0x1c2   : > { %2979 = vmatpush.bf16.msrb.mxu3 %v5569_v48  ;;  %2903 = vmatpush.bf16.msrb.mxu2 %v5556_v18 }
 0x1c3   : > { %2824 = vmatpush.bf16.msra.mxu1 %v5546_v15  ;;  %v5605_v15 = vld [vmem:[%s6840_s7 + $0xd4] sm:$0xf0] }
 0x1c6   : > { %2980 = vmatpush.bf16.msrb.mxu3 %v5568_v53  ;;  %2904 = vmatpush.bf16.msrb.mxu2 %v5555_v61 }
 0x1c8   : > { %v6359_v30 = vpop.f32.mrf.mxu2 }
 0x1c9   : > { %v1728_v41 = vadd.f32 %v6359_v30, %v6308_v11  ;;  %v5573_v11 = vld [vmem:[%s6838_s5 + $0x218] sm:$0xff] }
 0x1ca   : > { %2981 = vmatpush.bf16.msrb.mxu3 %v5567_v59  ;;  %2905 = vmatpush.bf16.msrb.mxu2 %v5554_v17  ;;  %v5603_v17 = vld [vmem:[%s6840_s7 + $0xcc] sm:$0xf] }
 0x1ce   : > { %2982 = vmatpush.bf16.msrb.mxu3 %v5566_v1  ;;  %v5608_v1 = vld [vmem:[%s6840_s7 + $0xec] sm:$0xf0] }
 0x1cf   : > { %v5186_v3 = vor.u32 %v5608_v1, %v5185_v0  ;;  %v5107_v0 = vld [vmem:[%s6840_s7 + $0x50] sm:$0xf0]  ;;  %v5113_v1 = vld [vmem:[%s6840_s7 + $0x48] sm:$0xf] }
 0x1d0   : > { %v6348_v26 = vpop.f32.mrf.mxu3 }
 0x1d1   : > { %v1814_v9 = vadd.f32 %v6348_v26, %v1727_v23  ;;  %v5171_v23 = vld [vmem:[%s6840_s7 + $0xd0] sm:$0xf0] }
 0x1d2   : > { %2983 = vmatpush.bf16.msrb.mxu3 %v5565_v8  ;;  %v5194_v8 = vor.u32 %v5609_v6, %v5193_v5  ;;  %v5587_v6 = vld [vmem:[%s6840_s7 + $0x4c] sm:$0xf] }
 0x1d6   : > { %2984 = vmatpush.bf16.msrb.mxu3 %v5564_v12  ;;  %v5604_v12 = vld [vmem:[%s6840_s7 + $0xcc] sm:$0xf0] }
 0x1d7   : > { %v5170_v61 = vor.u32 %v5604_v12, %v5169_v42  ;;  %v5582_v42 = vld [vmem:[%s6840_s7 + $0x24] sm:$0xf] }
 0x1d8   : > { %v6382_v38 = vpop.f32.mrf.mxu3 }
 0x1d9   : > { %v1815_v44 = vadd.f32 %v6382_v38, %v1728_v41  ;;  %v5145_v41 = vld [vmem:[%s6840_s7 + $0x88] sm:$0xf] }
 0x1da   : > { %2985 = vmatpush.bf16.msrb.mxu3 %v5563_v16  ;;  %v5174_v16 = vor.u32 %v5602_v13, %v5171_v23  ;;  %v5091_v13 = vld [vmem:[%s6840_s7 + $0x30] sm:$0xf0] }
 0x1db   : > { %v5094_v23 = vor.u32 %v5582_v42, %v5091_v13  ;;  %v3073_v13 = vld [vmem:[%s6839_s6] sm:$0x1] }
 0x1de   : > { %2986 = vmatpush.bf16.msrb.mxu3 %v5562_v22  ;;  %v5600_v22 = vld [vmem:[%s6840_s7 + $0xac] sm:$0xf0] }
 0x1e0   : > { %v6384_v39 = vpop.f32.mrf.mxu2 }
 0x1e1   : > { %v1901_v19 = vadd.f32 %v6384_v39, %v1814_v9 }
 0x1e8   : > { %v6424_v54 = vpop.f32.mrf.mxu2 }
 0x1e9   : > { %v1902_v45 = vadd.f32 %v6424_v54, %v1815_v44 }
 0x1f0   : > { %v6410_v49 = vpop.f32.mrf.mxu3 }
 0x1f1   : > { %v1988_v21 = vadd.f32 %v6410_v49, %v1901_v19  ;;  %v5179_v19 = vld [vmem:[%s6840_s7 + $0xd8] sm:$0xf0] }
 0x1f8   : > { %v6438_v60 = vpop.f32.mrf.mxu3 }
 0x1f9   : > { %v1989_v47 = vadd.f32 %v6438_v60, %v1902_v45  ;;  %v5570_v60 = vld [vmem:[%s6838_s5 + $0x200] sm:$0xff] }
 0x200   : > { %v2070_v2 = vpop.f32.mrf.mxu2 }
 0x201   : > { %v2075_v24 = vadd.f32 %v2070_v2, %v1988_v21  ;;  %v5606_v2 = vld [vmem:[%s6840_s7 + $0xe4] sm:$0xf]  ;;  %v5153_v21 = vld [vmem:[%s6840_s7 + $0xa0] sm:$0xf] }
 0x202   : > { %v5190_v7 = vor.u32 %v5606_v2, %v5187_v4  ;;  %v5589_v2 = vld [vmem:[%s6840_s7 + $0x54] sm:$0xf0] }
 0x203   : > { %v5114_v5 = vor.u32 %v5589_v2, %v5113_v1  ;;  %v5613_v2 = vld [vmem:[%s6842_s9 + $0x18] sm:$0xff] }
 0x208   : > { %v2072_v14 = vpop.f32.mrf.mxu2 }
 0x209   : > { %v2076_v48 = vadd.f32 %v2072_v14, %v1989_v47  ;;  %v5177_v14 = vld [vmem:[%s6840_s7 + $0xc8] sm:$0xf]  ;;  %v5147_v47 = vld [vmem:[%s6840_s7 + $0x98] sm:$0xf0] }
 0x20a   : > { %v5178_v9 = vor.u32 %v5605_v15, %v5177_v14  ;;  %v5585_v14 = vld [vmem:[%s6840_s7 + $0x34] sm:$0xf0]  ;;  %v5583_v15 = vld [vmem:[%s6840_s7 + $0x2c] sm:$0xf] }
 0x210   : > { %v2157_v10 = vpop.f32.mrf.mxu3 }
 0x211   : > { %v2162_v26 = vadd.f32 %v2157_v10, %v2075_v24  ;;  %v5607_v10 = vld [vmem:[%s6840_s7 + $0xec] sm:$0xf]  ;;  %v5598_v24 = vld [vmem:[%s6840_s7 + $0xa4] sm:$0xf] }
 0x212   : > { %v5198_v18 = vor.u32 %v5607_v10, %v5195_v58  ;;  %v5089_v58 = vld [vmem:[%s6840_s7 + $0x20] sm:$0xf] }
 0x218   : > { %v2159_v20 = vpop.f32.mrf.mxu3 }
 0x219   : > { %v2163_v30 = vadd.f32 %v2159_v20, %v2076_v48  ;;  %v5182_v20 = vor.u32 %v5603_v17, %v5179_v19  ;;  %v5073_v19 = vld [vmem:[%s6840_s7] sm:$0xf] }
 0x220   : > { %v2244_v25 = vpop.f32.mrf.mxu2 }
 0x221   : > { %v2249_v27 = vadd.f32 %v2244_v25, %v2162_v26  ;;  %v5154_v25 = vor.u32 %v5600_v22, %v5153_v21  ;;  %v5155_v26 = vld [vmem:[%s6840_s7 + $0xb0] sm:$0xf0]  ;;  %v5578_v21 = vld [vmem:[%s6840_s7 + $0x4] sm:$0xf] }
 0x228   : > { %v2246_v50 = vpop.f32.mrf.mxu2 }
 0x229   : > { %v2250_v53 = vadd.f32 %v2246_v50, %v2163_v30  ;;  %v5592_v50 = vld [vmem:[%s6840_s7 + $0x6c] sm:$0xf0] }
 0x230   : > { %v2331_v29 = vpop.f32.mrf.mxu3 }
 0x231   : > { %v2336_v31 = vadd.f32 %v2331_v29, %v2249_v27  ;;  %v5161_v27 = vld [vmem:[%s6840_s7 + $0xa8] sm:$0xf]  ;;  %v5158_v29 = vor.u32 %v5598_v24, %v5155_v26  ;;  %v5075_v24 = vld [vmem:[%s6840_s7 + $0x10] sm:$0xf0]  ;;  %v5581_v26 = vld [vmem:[%s6840_s7 + $0x14] sm:$0xf0] }
 0x233   : > { %v2342_v32 = vadd.f32 %v5651_v28, %v2336_v31 }
 0x235   : > { %v2344_v33 = vmax.f32 %v2342_v32, 0.0  ;;  %v5599_v32 = vld [vmem:[%s6840_s7 + $0xac] sm:$0xf] }
 0x237   : > { %v2346_v34 = vpack.c.bf16 %v2344_v33, %v2344_v33  ;;  %v5163_v33 = vld [vmem:[%s6840_s7 + $0xb8] sm:$0xf0] }
 0x238   : > { %v2333_v52 = vpop.f32.mrf.mxu3 }
 0x239   : > { %2501 = vmatmul.bf16.vlgmr.msrb.gmra.mxu1 %v2346_v34  ;;  %v2381_v36 = vshrl.u32 %v2346_v34, 16  ;;  %v2524_v37 = vrot.slane %v2346_v34, 1  ;;  %v2686_v38 = vrot.slane %v2346_v34, 2  ;;  %v2848_v51 = vrot.slane %v2346_v34, 3 }
 0x23a   : > { %v2337_v56 = vadd.f32 %v2333_v52, %v2250_v53  ;;  %3279 = vmatpush.bf16.msrb.mxu1 %v5186_v3  ;;  %v5166_v34 = vor.u32 %v5599_v32, %v5163_v33  ;;  %v5593_v52 = vld [vmem:[%s6840_s7 + $0x74] sm:$0xf0]  ;;  %v5579_v32 = vld [vmem:[%s6840_s7 + $0xc] sm:$0xf]  ;;  %v5083_v33 = vld [vmem:[%s6840_s7 + $0x18] sm:$0xf0] }
 0x23b   : > { %2440 = vmatmul.bf16.vlgmr.msrb.gmra.mxu0 %v2381_v36  ;;  %2582 = vmatmul.bf16.vlgmr.msra.gmra.mxu2 %v2524_v37  ;;  %v2605_v39 = vrot.slane %v2381_v36, 1  ;;  %v2767_v49 = vrot.slane %v2381_v36, 2  ;;  %v2929_v54 = vrot.slane %v2381_v36, 3  ;;  %v5596_v36 = vld [vmem:[%s6840_s7 + $0x8c] sm:$0xf0] }
 0x23c   : > { %3059 = vmatpush.bf16.msrb.mxu0 %v5577_v35  ;;  %v2343_v59 = vadd.f32 %v5651_v28, %v2337_v56  ;;  %3292 = vmatpush.bf16.msra.mxu2 %v5190_v7  ;;  %v5601_v28 = vld [vmem:[%s6840_s7 + $0xb4] sm:$0xf0]  ;;  %v5137_v35 = vld [vmem:[%s6840_s7 + $0x80] sm:$0xf]  ;;  %v5594_v37 = vld [vmem:[%s6840_s7 + $0x84] sm:$0xf] }
 0x23d   : > { %2663 = vmatmul.bf16.vlgmr.msra.gmra.mxu3 %v2605_v39  ;;  %v5162_v31 = vor.u32 %v5601_v28, %v5161_v27  ;;  %v5138_v39 = vor.u32 %v5596_v36, %v5137_v35  ;;  %v5131_v56 = vld [vmem:[%s6840_s7 + $0x78] sm:$0xf0] }
 0x23e   : > { %v2345_v62 = vmax.f32 %v2343_v59, 0.0  ;;  %3305 = vmatpush.bf16.msra.mxu3 %v5194_v8  ;;  %3280 = vmatpush.bf16.msrb.mxu1 %v5170_v61  ;;  %v5105_v59 = vld [vmem:[%s6840_s7 + $0x40] sm:$0xf]  ;;  %v5115_v7 = vld [vmem:[%s6840_s7 + $0x58] sm:$0xf0] }
 0x23f   : > { %v5118_v8 = vor.u32 %v5587_v6, %v5115_v7  ;;  %v5097_v61 = vld [vmem:[%s6840_s7 + $0x28] sm:$0xf]  ;;  %v5629_v6 = vld [vmem:[%s6842_s9 + $0x98] sm:$0xff] }
 0x240   : > { %3060 = vmatpush.bf16.msrb.mxu0 %v5576_v40  ;;  %v2993_v63 = vpack.c.bf16 %v2345_v62, %v2345_v62  ;;  %3293 = vmatpush.bf16.msra.mxu2 %v5174_v16  ;;  %v5139_v40 = vld [vmem:[%s6840_s7 + $0x90] sm:$0xf0]  ;;  %v5586_v62 = vld [vmem:[%s6840_s7 + $0x44] sm:$0xf]  ;;  %v5099_v16 = vld [vmem:[%s6840_s7 + $0x38] sm:$0xf0] }
 0x241   : > { %v5142_v44 = vor.u32 %v5594_v37, %v5139_v40  ;;  %v5110_v4 = vor.u32 %v5586_v62, %v5107_v0  ;;  %v5102_v17 = vor.u32 %v5583_v15, %v5099_v16  ;;  %v5617_v37 = vld [vmem:[%s6842_s9 + $0x38] sm:$0xff] }
 0x242   : > { %3306 = vmatpush.bf16.msra.mxu3 %v5178_v9  ;;  %3281 = vmatpush.bf16.msrb.mxu1 %v5154_v25  ;;  %v5098_v9 = vor.u32 %v5585_v14, %v5097_v61  ;;  %v5081_v25 = vld [vmem:[%s6840_s7 + $0x8] sm:$0xf]  ;;  %v5625_v40 = vld [vmem:[%s6842_s9 + $0x78] sm:$0xff] }
 0x244   : > { %3061 = vmatpush.bf16.msrb.mxu0 %v5575_v43  ;;  %3294 = vmatpush.bf16.msra.mxu2 %v5158_v29  ;;  %v5597_v43 = vld [vmem:[%s6840_s7 + $0x94] sm:$0xf0]  ;;  %v5078_v29 = vor.u32 %v5578_v21, %v5075_v24  ;;  %v5610_v21 = vld [vmem:[%s6842_s9] sm:$0xff]  ;;  %v5619_v24 = vld [vmem:[%s6842_s9 + $0x48] sm:$0xff] }
 0x245   : > { %v5146_v45 = vor.u32 %v5597_v43, %v5145_v41  ;;  %v5633_v41 = vld [vmem:[%s6842_s9 + $0xb8] sm:$0xff]  ;;  %v5616_v43 = vld [vmem:[%s6842_s9 + $0x30] sm:$0xff] }
 0x246   : > { %3307 = vmatpush.bf16.msra.mxu3 %v5162_v31  ;;  %3282 = vmatpush.bf16.msrb.mxu1 %v5138_v39  ;;  %v5082_v31 = vor.u32 %v5581_v26, %v5081_v25  ;;  %v5641_v39 = vld [vmem:[%s6842_s9 + $0xf8] sm:$0xff]  ;;  %v5627_v25 = vld [vmem:[%s6842_s9 + $0x88] sm:$0xff]  ;;  %v5618_v26 = vld [vmem:[%s6842_s9 + $0x40] sm:$0xff] }
 0x248   : > { %3062 = vmatpush.bf16.msrb.mxu0 %v5574_v46  ;;  %v5595_v46 = vld [vmem:[%s6840_s7 + $0x8c] sm:$0xf]  ;;  %3295 = vmatpush.bf16.msra.mxu2 %v5142_v44  ;;  %v5640_v44 = vld [vmem:[%s6842_s9 + $0xf0] sm:$0xff] }
 0x249   : > { %2825 = vmatmul.bf16.vlgmr.msra.gmra.mxu1 %v2767_v49  ;;  %v5150_v48 = vor.u32 %v5595_v46, %v5147_v47  ;;  %v5121_v49 = vld [vmem:[%s6840_s7 + $0x60] sm:$0xf]  ;;  %v5624_v46 = vld [vmem:[%s6842_s9 + $0x70] sm:$0xff] }
 0x24a   : > { %3308 = vmatpush.bf16.msra.mxu3 %v5146_v45  ;;  %v5122_v30 = vor.u32 %v5592_v50, %v5121_v49  ;;  %v5632_v47 = vld [vmem:[%s6842_s9 + $0xb0] sm:$0xff] }
 0x24b   : > { %2744 = vmatmul.bf16.vlgmr.msra.gmra.mxu0 %v2686_v38  ;;  %2906 = vmatmul.bf16.vlgmr.msrb.gmra.mxu2 %v2848_v51  ;;  %v5123_v38 = vld [vmem:[%s6840_s7 + $0x70] sm:$0xf0]  ;;  %v5129_v51 = vld [vmem:[%s6840_s7 + $0x68] sm:$0xf] }
 0x24c   : > { %3063 = vmatpush.bf16.msrb.mxu0 %v5573_v11  ;;  %v5590_v11 = vld [vmem:[%s6840_s7 + $0x64] sm:$0xf]  ;;  %3283 = vmatpush.bf16.msrb.mxu1 %v5122_v30 }
 0x24d   : > { %2987 = vmatmul.bf16.vlgmr.msrb.gmra.mxu3 %v2929_v54  ;;  %v5126_v53 = vor.u32 %v5590_v11, %v5123_v38  ;;  %v5130_v54 = vor.u32 %v5593_v52, %v5129_v51  ;;  %v5615_v38 = vld [vmem:[%s6842_s9 + $0x28] sm:$0xff] }
 0x24e   : > { %v5639_v51 = vld [vmem:[%s6842_s9 + $0xe8] sm:$0xff] }
 0x24f   : > { %3296 = vmatpush.bf16.msra.mxu2 %v5126_v53  ;;  %3309 = vmatpush.bf16.msra.mxu3 %v5130_v54  ;;  %v5623_v52 = vld [vmem:[%s6842_s9 + $0x68] sm:$0xff] }
 0x250   : > { %3064 = vmatpush.bf16.msrb.mxu0 %v5572_v55  ;;  %v5591_v55 = vld [vmem:[%s6840_s7 + $0x6c] sm:$0xf] }
 0x251   : > { %v5631_v53 = vld [vmem:[%s6842_s9 + $0xa8] sm:$0xff] }
 0x253   : > { %3297 = vmatpush.bf16.msra.mxu2 %v5110_v4  ;;  %3310 = vmatpush.bf16.msra.mxu3 %v5114_v5  ;;  %v5621_v5 = vld [vmem:[%s6842_s9 + $0x58] sm:$0xff] }
 0x254   : > { %3065 = vmatpush.bf16.msrb.mxu0 %v5571_v57  ;;  %v5134_v57 = vor.u32 %v5591_v55, %v5131_v56  ;;  %v5614_v55 = vld [vmem:[%s6842_s9 + $0x20] sm:$0xff] }
 0x255   : > { %v5638_v56 = vld [vmem:[%s6842_s9 + $0xe0] sm:$0xff] }
 0x257   : > { %3298 = vmatpush.bf16.msra.mxu2 %v5094_v23  ;;  %3311 = vmatpush.bf16.msra.mxu3 %v5098_v9  ;;  %v5611_v9 = vld [vmem:[%s6842_s9 + $0x8] sm:$0xff] }
 0x258   : > { %3066 = vmatpush.bf16.msrb.mxu0 %v5570_v60  ;;  %v5588_v60 = vld [vmem:[%s6840_s7 + $0x4c] sm:$0xf0] }
 0x25b   : > { %3067 = vmatmul.bf16.vlgmr.msrb.gmra.mxu0 %v2993_v63  ;;  %v5106_v63 = vor.u32 %v5588_v60, %v5105_v59  ;;  %3299 = vmatpush.bf16.msra.mxu2 %v5078_v29  ;;  %v5622_v59 = vld [vmem:[%s6842_s9 + $0x60] sm:$0xff] }
 0x25c   : > { %3318 = vmatpush.bf16.msra.mxu0 %v5198_v18  ;;  %v5584_v18 = vld [vmem:[%s6840_s7 + $0x2c] sm:$0xf0]  ;;  %3312 = vmatpush.bf16.msra.mxu3 %v5082_v31  ;;  %v5630_v60 = vld [vmem:[%s6842_s9 + $0xa0] sm:$0xff] }
 0x25d   : > { %3284 = vmatpush.bf16.msrb.mxu1 %v5106_v63  ;;  %v5090_v12 = vor.u32 %v5584_v18, %v5089_v58 }
 0x25f   : > { %3609 = vmatpush.bf16.msrb.mxu2 %v5625_v40 }
 0x260   : > { %3319 = vmatpush.bf16.msra.mxu0 %v5182_v20  ;;  %v5580_v20 = vld [vmem:[%s6840_s7 + $0xc] sm:$0xf0]  ;;  %3622 = vmatpush.bf16.msrb.mxu3 %v5633_v41 }
 0x261   : > { %3285 = vmatpush.bf16.msrb.mxu1 %v5090_v12  ;;  %v5074_v22 = vor.u32 %v5580_v20, %v5073_v19  ;;  %v5620_v19 = vld [vmem:[%s6842_s9 + $0x50] sm:$0xff] }
 0x262   : > { %v5628_v20 = vld [vmem:[%s6842_s9 + $0x90] sm:$0xff] }
 0x263   : > { %3610 = vmatpush.bf16.msrb.mxu2 %v5624_v46 }
 0x264   : > { %3320 = vmatpush.bf16.msra.mxu0 %v5166_v34  ;;  %v5086_v34 = vor.u32 %v5579_v32, %v5083_v33  ;;  %3623 = vmatpush.bf16.msrb.mxu3 %v5632_v47 }
 0x265   : > { %3286 = vmatpush.bf16.msrb.mxu1 %v5074_v22  ;;  %v5634_v22 = vld [vmem:[%s6842_s9 + $0xc0] sm:$0xff] }
 0x267   : > { %3611 = vmatpush.bf16.msrb.mxu2 %v5623_v52 }
 0x268   : > { %3321 = vmatpush.bf16.msra.mxu0 %v5150_v48  ;;  %3624 = vmatpush.bf16.msrb.mxu3 %v5631_v53 }
 0x269   : > { %3596 = vmatpush.bf16.msra.mxu1 %v5617_v37 }
 0x26b   : > { %3612 = vmatpush.bf16.msrb.mxu2 %v5622_v59 }
 0x26c   : > { %3322 = vmatpush.bf16.msra.mxu0 %v5134_v57  ;;  %3625 = vmatpush.bf16.msrb.mxu3 %v5630_v60 }
 0x26d   : > { %3597 = vmatpush.bf16.msra.mxu1 %v5616_v43 }
 0x26f   : > { %3613 = vmatpush.bf16.msrb.mxu2 %v5621_v5 }
 0x270   : > { %3323 = vmatpush.bf16.msra.mxu0 %v5118_v8  ;;  %v5612_v8 = vld [vmem:[%s6842_s9 + $0x10] sm:$0xff]  ;;  %3626 = vmatpush.bf16.msrb.mxu3 %v5629_v6 }
 0x271   : > { %3598 = vmatpush.bf16.msra.mxu1 %v5615_v38 }
 0x273   : > { %3614 = vmatpush.bf16.msrb.mxu2 %v5620_v19 }
 0x274   : > { %3324 = vmatpush.bf16.msra.mxu0 %v5102_v17  ;;  %v5635_v17 = vld [vmem:[%s6842_s9 + $0xc8] sm:$0xff]  ;;  %3627 = vmatpush.bf16.msrb.mxu3 %v5628_v20 }
 0x275   : > { %3599 = vmatpush.bf16.msra.mxu1 %v5614_v55  ;;  %v3403_v55 = vld [vmem:[%s6843_s10] sm:$0x1] }
 0x277   : > { %3615 = vmatpush.bf16.msrb.mxu2 %v5619_v24 }
 0x278   : > { %3325 = vmatpush.bf16.msra.mxu0 %v5086_v34  ;;  %3628 = vmatpush.bf16.msrb.mxu3 %v5627_v25 }
 0x279   : > { %3600 = vmatpush.bf16.msra.mxu1 %v5613_v2 }
 0x27b   : > { %3616 = vmatpush.bf16.msrb.mxu2 %v5618_v26 }
 0x27c   : > { %3635 = vmatpush.bf16.msrb.mxu0 %v5641_v39 }
 0x27d   : > { %3601 = vmatpush.bf16.msra.mxu1 %v5612_v8 }
 0x280   : > { %3636 = vmatpush.bf16.msrb.mxu0 %v5640_v44 }
 0x281   : > { %3602 = vmatpush.bf16.msra.mxu1 %v5611_v9 }
 0x284   : > { %3637 = vmatpush.bf16.msrb.mxu0 %v5639_v51 }
 0x285   : > { %3603 = vmatpush.bf16.msra.mxu1 %v5610_v21 }
 0x288   : > { %3638 = vmatpush.bf16.msrb.mxu0 %v5638_v56 }
 0x2b6   : > { %v2502_v3 = vpop.f32.mrf.mxu1 }
 0x2b8   : > { %v2441_v10 = vpop.f32.mrf.mxu0 }
 0x2b9   : > { %v2503_v45 = vadd.f32 %v2502_v3, %v2441_v10  ;;  %v5637_v3 = vld [vmem:[%s6842_s9 + $0xd8] sm:$0xff]  ;;  %v5636_v10 = vld [vmem:[%s6842_s9 + $0xd0] sm:$0xff] }
 0x2ba   : > { %3639 = vmatpush.bf16.msrb.mxu0 %v5637_v3 }
 0x2be   : > { %v2504_v27 = vpop.f32.mrf.mxu1  ;;  %v2583_v28 = vpop.f32.mrf.mxu2  ;;  %3640 = vmatpush.bf16.msrb.mxu0 %v5636_v10 }
 0x2bf   : > { %v2587_v50 = vadd.f32 %v2583_v28, %v2503_v45  ;;  %v5626_v27 = vld [vmem:[%s6842_s9 + $0x80] sm:$0xff] }
 0x2c0   : > { %v2443_v35 = vpop.f32.mrf.mxu0  ;;  %v2664_v36 = vpop.f32.mrf.mxu3  ;;  %3629 = vmatpush.bf16.msrb.mxu3 %v5626_v27  ;;  %v3109_v28 = vld [vmem:[%s6841_s8] sm:$0xf] }
 0x2c1   : > { %v2668_v54 = vadd.f32 %v2664_v36, %v2587_v50  ;;  %v3271_v29 = vperm.slane %v3109_v28, 0  ;;  %v3274_v31 = vperm.slane %v3109_v28, 3  ;;  %v3272_v37 = vperm.slane %v3109_v28, 1 }
 0x2c2   : > { %3641 = vmatpush.bf16.msrb.mxu0 %v5635_v17  ;;  %v3273_v40 = vperm.slane %v3109_v28, 2 }
 0x2c6   : > { %v2585_v48 = vpop.f32.mrf.mxu2  ;;  %v2826_v49 = vpop.f32.mrf.mxu1  ;;  %3642 = vmatpush.bf16.msrb.mxu0 %v5634_v22 }
 0x2c8   : > { %v2666_v11 = vpop.f32.mrf.mxu3  ;;  %v2745_v30 = vpop.f32.mrf.mxu0 }
 0x2c9   : > { %v2749_v57 = vadd.f32 %v2745_v30, %v2668_v54 }
 0x2cb   : > { %v2830_v4 = vadd.f32 %v2826_v49, %v2749_v57 }
 0x2ce   : > { %v2828_v62 = vpop.f32.mrf.mxu1  ;;  %v2907_v63 = vpop.f32.mrf.mxu2 }
 0x2cf   : > { %v2911_v7 = vadd.f32 %v2907_v63, %v2830_v4 }
 0x2d0   : > { %v2747_v0 = vpop.f32.mrf.mxu0  ;;  %v2988_v1 = vpop.f32.mrf.mxu3 }
 0x2d1   : > { %v2992_v18 = vadd.f32 %v2988_v1, %v2911_v7 }
 0x2d6   : > { %v2909_v58 = vpop.f32.mrf.mxu2 }
 0x2d8   : > { %v2990_v42 = vpop.f32.mrf.mxu3  ;;  %v3068_v12 = vpop.f32.mrf.mxu0 }
 0x2d9   : > { %v3072_v61 = vadd.f32 %v3068_v12, %v2992_v18 }
 0x2db   : > { %v3074_v23 = vadd.f32 %v3073_v13, %v3072_v61 }
 0x2dd   : > { %v3075_v14 = vmax.f32 %v3074_v23, 0.0 }
 0x2df   : > { %v3076_v15 = vpack.c.bf16 %v3075_v14, %v3075_v14 }
 0x2e0   : > { %v3070_v16 = vpop.f32.mrf.mxu0 }
 0x2e1   : > { %3287 = vmatmul.bf16.vlgmr.msrb.gmra.mxu1 %v3076_v15  ;;  %3300 = vmatmul.bf16.vlgmr.msra.gmra.mxu2 %v3076_v15 }
 0x2e2   : > { %3313 = vmatmul.bf16.vlgmr.msra.gmra.mxu3 %v3076_v15  ;;  %3326 = vmatmul.bf16.vlgmr.msra.gmra.mxu0 %v3076_v15 }
 0x35e   : > { %v3288_v32 = vpop.f32.mrf.mxu1 }
 0x35f   : > { %v3289_v33 = vadd.f32 %v3288_v32, %v3271_v29  ;;  %v3327_v34 = vpop.f32.mrf.mxu0 }
 0x360   : > { %v3328_v35 = vadd.f32 %v3327_v34, %v3274_v31 }
 0x361   : > { %v3331_v36 = vmax.f32 %v3289_v33, 0.0 }
 0x362   : > { %v3334_v39 = vmax.f32 %v3328_v35, 0.0 }
 0x363   : > { %v3335_v41 = vpack.c.bf16 %v3331_v36, %v3331_v36 }
 0x364   : > { %v3338_v43 = vpack.c.bf16 %v3334_v39, %v3334_v39  ;;  %v3301_v44 = vpop.f32.mrf.mxu2 }
 0x365   : > { %v3302_v45 = vadd.f32 %v3301_v44, %v3272_v37  ;;  %v3314_v46 = vpop.f32.mrf.mxu3  ;;  %3604 = vmatmul.bf16.vlgmr.msra.gmra.mxu1 %v3335_v41 }
 0x366   : > { %v3315_v47 = vadd.f32 %v3314_v46, %v3273_v40  ;;  %3643 = vmatmul.bf16.vlgmr.msrb.gmra.mxu0 %v3338_v43  ;;  %v3290_v48 = vpop.f32.mrf.mxu1 }
 0x367   : > { %v3332_v49 = vmax.f32 %v3302_v45, 0.0  ;;  %v3329_v50 = vpop.f32.mrf.mxu0 }
 0x368   : > { %v3333_v11 = vmax.f32 %v3315_v47, 0.0 }
 0x369   : > { %v3336_v30 = vpack.c.bf16 %v3332_v49, %v3332_v49 }
 0x36a   : > { %v3337_v38 = vpack.c.bf16 %v3333_v11, %v3333_v11 }
 0x36b   : > { %3617 = vmatmul.bf16.vlgmr.msrb.gmra.mxu2 %v3336_v30 }
 0x36c   : > { %3630 = vmatmul.bf16.vlgmr.msrb.gmra.mxu3 %v3337_v38  ;;  %v3303_v51 = vpop.f32.mrf.mxu2 }
 0x36d   : > { %v3316_v52 = vpop.f32.mrf.mxu3 }
 0x3e2   : > { %v3605_v53 = vpop.f32.mrf.mxu1 }
 0x3e3   : > { %v3644_v54 = vpop.f32.mrf.mxu0  ;;  %v3606_v59 = vadd.f32 %v3605_v53, %v3403_v55 }
 0x3ea   : > { %v3607_v56 = vpop.f32.mrf.mxu1 }
 0x3eb   : > { %v3646_v57 = vpop.f32.mrf.mxu0 }
 0x3ee   : > { %v3618_v60 = vpop.f32.mrf.mxu2 }
 0x3ef   : > { %v3619_v62 = vadd.f32 %v3618_v60, %v3606_v59  ;;  %v3631_v63 = vpop.f32.mrf.mxu3 }
 0x3f1   : > { %v3632_v0 = vadd.f32 %v3631_v63, %v3619_v62 }
 0x3f3   : > { %v3645_v1 = vadd.f32 %v3644_v54, %v3632_v0 }
 0x3f5   : > { %v3648_v2 = vperm.slane %v3645_v1, 0 }
 0x3f6   : > { %v3620_v3 = vpop.f32.mrf.mxu2 }
 0x3f7   : > { %3649 = vst [vmem:[%s384_s14] sm:$0xff] %v3648_v2  ;;  %v3633_v4 = vpop.f32.mrf.mxu3 }
 0x3f8 PF: > { %s21_s17 = sadd.s32 1, %s5659_s17  }
 0x3f9   : > { %p18_p4 = scmp.ge.s32.totalorder %s21_s17, 4  }
 0x3fb   :  { %20 = sbr.rel (!%p18_p4) target bundleno = 1 (0x1), region = 117 }

</bundles_post_ra>
